<compile_context>
chip_gen: v6e
topology: v6e:2x2x1
jax: 0.10.0
libtpu: 0.0.40
codegen_flags: <defaults>
</compile_context>

<pallas_src>
import math
import functools

import jax
import jax.numpy as jnp
from jax import lax
from jax.experimental import pallas as pl
from jax.experimental.pallas import tpu as pltpu


def _round_up(x, m):
    return ((x + m - 1) // m) * m


def _ac_kernel(state_ref, action_ref, pack_ref, w1_ref, aw2_ref, cw2_ref, aw3_ref,
               out_ref, *, action_dim):
    H = aw2_ref.shape[0]          # hidden size (512)
    Bt = out_ref.shape[0]
    OUT = out_ref.shape[1]        # lane-dense output width (>=128)

    # ---- unpack fused biases / constants; every slice boundary is 128-lane aligned ----
    b1        = pack_ref[:, 0:2 * H]                          # fused actor|critic layer-1 bias
    ab2       = pack_ref[:, 2 * H:3 * H]
    cb2       = pack_ref[:, 3 * H:4 * H]
    ab3       = pack_ref[:, 4 * H:4 * H + OUT]                # actor layer-3 bias (zero padded)
    cw3t      = pack_ref[:, 4 * H + OUT:5 * H + OUT]          # critic layer-3 weight as a row
    inv_var   = pack_ref[:, 5 * H + OUT:5 * H + 2 * OUT]      # 1/var, zero on padded lanes
    const_row = pack_ref[:, 5 * H + 2 * OUT:5 * H + 3 * OUT]  # lane A: logp_const, A+1: cb3, A+2: ent_const

    x = state_ref[...]            # (Bt, F)   f32
    act = action_ref[...]         # (Bt, OUT) f32, zero past lane A

    # ---- shared layer 1 (actor | critic fused into one MXU matmul) ----
    hg = jnp.dot(x.astype(jnp.bfloat16), w1_ref[...],
                 preferred_element_type=jnp.float32) + b1
    hg = jnp.maximum(hg, 0.0)
    h = hg[:, :H]                 # actor branch  (128-aligned static slice)
    g = hg[:, H:]                 # critic branch

    # ---- actor layers 2/3 ----
    h = jnp.dot(h.astype(jnp.bfloat16), aw2_ref[...],
                preferred_element_type=jnp.float32) + ab2
    h = jnp.maximum(h, 0.0)
    mean_pad = jnp.dot(h.astype(jnp.bfloat16), aw3_ref[...],
                       preferred_element_type=jnp.float32) + ab3     # (Bt, OUT); lanes >= A are 0

    # ---- critic layers 2/3 (final (H,1) matmul done as VPU mul + lane reduce) ----
    g = jnp.dot(g.astype(jnp.bfloat16), cw2_ref[...],
                preferred_element_type=jnp.float32) + cb2
    g = jnp.maximum(g, 0.0)
    val_raw = jnp.sum(g * cw3t, axis=-1, keepdims=True)              # (Bt, 1); cb3 folded into const_row

    # ---- diagonal MultivariateNormal log_prob (padded lanes contribute 0: inv_var=0) ----
    diff = act - mean_pad
    maha = jnp.sum(diff * diff * inv_var, axis=-1, keepdims=True)    # (Bt, 1)

    # ---- assemble one lane-dense output slab (no narrow masked stores) ----
    col = lax.broadcasted_iota(jnp.int32, (Bt, OUT), 1)
    extra = jnp.where(col == action_dim, -0.5 * maha,
                      jnp.where(col == action_dim + 1, val_raw, 0.0))
    out_ref[...] = mean_pad + const_row + extra


@functools.partial(jax.jit, static_argnames=("block_b",))
def actor_critic_evaluate(state, action, action_var, params, *, block_b=256):
    """state: (B, F) f32; action: (B, A) f32; action_var: (1, A) f32.

    Returns (action_logprobs (B,1), state_values (B,1), dist_entropy (B,1),
             action_mean (B,A)) -- same semantics as ActorCritic.evaluate, with
    the 1-D PyTorch outputs kept as (B,1) lane-dense slabs.
    """
    B, F = state.shape
    A = action.shape[1]
    (aw1, ab1, aw2, ab2, aw3, ab3, cw1, cb1, cw2, cb2, cw3, cb3) = params
    H = aw2.shape[0]
    OUT = max(128, _round_up(A + 3, 128))     # lane-dense output width

    # Batch tiling: Bt rows per grid step, weights stay resident across the grid.
    Bt = min(block_b, _round_up(B, 8))
    B_pad = _round_up(B, Bt)

    # ---- weight packing (bf16 for the MXU) ----
    w1 = jnp.concatenate([aw1, cw1], axis=1).astype(jnp.bfloat16)               # (F, 2H)
    aw2b = aw2.astype(jnp.bfloat16)
    cw2b = cw2.astype(jnp.bfloat16)
    aw3p = jnp.zeros((H, OUT), jnp.float32).at[:, :A].set(aw3).astype(jnp.bfloat16)

    # ---- batch-independent Gaussian constants computed once in the wrapper ----
    var = action_var.reshape(1, A).astype(jnp.float32)
    log_two_pi = math.log(2.0 * math.pi)
    sum_log_var = jnp.sum(jnp.log(var))
    logp_const = -0.5 * (A * log_two_pi + sum_log_var)
    ent_const = 0.5 * A * (1.0 + log_two_pi) + 0.5 * sum_log_var

    ab3p = jnp.zeros((1, OUT), jnp.float32).at[:, :A].set(ab3)
    inv_var = jnp.zeros((1, OUT), jnp.float32).at[:, :A].set(1.0 / var)
    const_row = (jnp.zeros((1, OUT), jnp.float32)
                 .at[0, A].set(logp_const)
                 .at[0, A + 1].set(cb3[0, 0])
                 .at[0, A + 2].set(ent_const))

    pack = jnp.concatenate(
        [jnp.concatenate([ab1, cb1], axis=1),   # [0, 2H)
         ab2,                                   # [2H, 3H)
         cb2,                                   # [3H, 4H)
         ab3p,                                  # [4H, 4H+OUT)
         cw3.reshape(1, H),                     # [4H+OUT, 5H+OUT)
         inv_var,                               # [5H+OUT, 5H+2*OUT)
         const_row],                            # [5H+2*OUT, 5H+3*OUT)
        axis=1).astype(jnp.float32)

    # zero-pad batch to a tile multiple; pad action lanes out to OUT.
    x_p = jnp.zeros((B_pad, F), jnp.float32).at[:B].set(state.astype(jnp.float32))
    a_p = jnp.zeros((B_pad, OUT), jnp.float32).at[:B, :A].set(action.astype(jnp.float32))

    kernel = functools.partial(_ac_kernel, action_dim=A)

    slab = pl.pallas_call(
        kernel,
        out_shape=jax.ShapeDtypeStruct((B_pad, OUT), jnp.float32),
        grid_spec=pltpu.PrefetchScalarGridSpec(
            num_scalar_prefetch=0,
            grid=(B_pad // Bt,),
            in_specs=[
                pl.BlockSpec((Bt, F), lambda i: (i, 0)),      # state tile (pipelined)
                pl.BlockSpec((Bt, OUT), lambda i: (i, 0)),    # action tile (pipelined)
                pl.BlockSpec(pack.shape, lambda i: (0, 0)),   # biases/consts (resident)
                pl.BlockSpec(w1.shape, lambda i: (0, 0)),     # fused layer-1 weight (resident)
                pl.BlockSpec(aw2b.shape, lambda i: (0, 0)),
                pl.BlockSpec(cw2b.shape, lambda i: (0, 0)),
                pl.BlockSpec(aw3p.shape, lambda i: (0, 0)),
            ],
            out_specs=pl.BlockSpec((Bt, OUT), lambda i: (i, 0)),
        ),
        compiler_params=pltpu.CompilerParams(
            dimension_semantics=("parallel",),    # batch tiles are independent -> megacore sharding
            vmem_limit_bytes=16 << 20,            # actual working set is a few MiB
        ),
    )(x_p, a_p, pack, w1, aw2b, cw2b, aw3p)

    mean = slab[:B, :A]
    logp = slab[:B, A:A + 1]
    val = slab[:B, A + 1:A + 2]
    ent = slab[:B, A + 2:A + 3]
    return logp, val, ent, mean


def _init_policy_net(key, in_dim, out_dim, hidden):
    """Deterministic MLP init: Linear(in,h) -> ReLU -> Linear(h,h) -> ReLU -> Linear(h,out)."""
    ks = jax.random.split(key, 6)

    def lin(kw, kb, fan_in, fan_out):
        bound = 1.0 / math.sqrt(fan_in)
        w = jax.random.uniform(kw, (fan_in, fan_out), jnp.float32, -bound, bound)
        b = jax.random.uniform(kb, (1, fan_out), jnp.float32, -bound, bound)
        return w, b

    w1, b1 = lin(ks[0], ks[1], in_dim, hidden)
    w2, b2 = lin(ks[2], ks[3], hidden, hidden)
    w3, b3 = lin(ks[4], ks[5], hidden, out_dim)
    return (w1, b1, w2, b2, w3, b3)


def _reference(state, action, action_var, params):
    (aw1, ab1, aw2, ab2, aw3, ab3, cw1, cb1, cw2, cb2, cw3, cb3) = params
    h = jnp.maximum(state @ aw1 + ab1, 0.0)
    h = jnp.maximum(h @ aw2 + ab2, 0.0)
    mean = h @ aw3 + ab3
    g = jnp.maximum(state @ cw1 + cb1, 0.0)
    g = jnp.maximum(g @ cw2 + cb2, 0.0)
    val = g @ cw3 + cb3
    A = mean.shape[-1]
    log_two_pi = math.log(2.0 * math.pi)
    sum_log_var = jnp.sum(jnp.log(action_var), axis=-1, keepdims=True)
    diff = action - mean
    logp = -0.5 * (jnp.sum(diff * diff / action_var, axis=-1, keepdims=True)
                   + A * log_two_pi + sum_log_var)
    ent = jnp.broadcast_to(0.5 * A * (1.0 + log_two_pi) + 0.5 * sum_log_var,
                           (mean.shape[0], 1))
    return logp, val, ent, mean


if __name__ == "__main__":
    B, feat_dim, action_dim, hidden = 8, 32, 4, 512
    action_std_init = 0.6

    key = jax.random.PRNGKey(0)
    k_state, k_action, k_actor, k_critic = jax.random.split(key, 4)

    state = jax.random.normal(k_state, (B, feat_dim), jnp.float32)
    action = jax.random.normal(k_action, (B, action_dim), jnp.float32)
    action_var = jnp.full((1, action_dim), action_std_init * action_std_init, jnp.float32)

    actor_params = _init_policy_net(k_actor, feat_dim, action_dim, hidden)
    critic_params = _init_policy_net(k_critic, feat_dim, 1, hidden)
    params = actor_params + critic_params

    logp, val, ent, mean = jax.block_until_ready(
        actor_critic_evaluate(state, action, action_var, params))

    # f32 reference; kernel uses bf16 MXU inputs with f32 accumulation -> looser tolerance.
    r_logp, r_val, r_ent, r_mean = _reference(state, action, action_var, params)
    assert jnp.allclose(mean, r_mean, atol=5e-2, rtol=5e-2)
    assert jnp.allclose(val, r_val, atol=5e-2, rtol=5e-2)
    assert jnp.allclose(logp, r_logp, atol=5e-2, rtol=5e-2)
    assert jnp.allclose(ent, r_ent, atol=5e-2, rtol=5e-2)

    print("KERNEL_OK")
</pallas_src>

<mosaic_0001>
module attributes {stable_mosaic.version = 11 : i64} {
  func.func @_ac_kernel(%arg0: i32, %arg1: memref<8x32xf32, #tpu.memory_space<vmem>>, %arg2: memref<8x128xf32, #tpu.memory_space<vmem>>, %arg3: memref<1x2944xf32, #tpu.memory_space<vmem>>, %arg4: memref<32x1024xbf16, #tpu.memory_space<vmem>>, %arg5: memref<512x512xbf16, #tpu.memory_space<vmem>>, %arg6: memref<512x512xbf16, #tpu.memory_space<vmem>>, %arg7: memref<512x128xbf16, #tpu.memory_space<vmem>>, %arg8: memref<8x128xf32, #tpu.memory_space<vmem>>) attributes {dimension_semantics = [#tpu.dimension_semantics<parallel>], iteration_bounds = array<i64: 1>, scalar_prefetch = 0 : i64, scratch_operands = 0 : i64, tpu.core_type = #tpu.core_type<tc>, window_params = [{transform_indices = @transform_0, window_bounds = array<i64: 8, 32>}, {transform_indices = @transform_1, window_bounds = array<i64: 8, 128>}, {pipeline_mode = #tpu.pipeline_mode<synchronous>, transform_indices = @transform_2, window_bounds = array<i64: 1, 2944>}, {pipeline_mode = #tpu.pipeline_mode<synchronous>, transform_indices = @transform_3, window_bounds = array<i64: 32, 1024>}, {pipeline_mode = #tpu.pipeline_mode<synchronous>, transform_indices = @transform_4, window_bounds = array<i64: 512, 512>}, {pipeline_mode = #tpu.pipeline_mode<synchronous>, transform_indices = @transform_5, window_bounds = array<i64: 512, 512>}, {pipeline_mode = #tpu.pipeline_mode<synchronous>, transform_indices = @transform_6, window_bounds = array<i64: 512, 128>}, {transform_indices = @transform_7, window_bounds = array<i64: 8, 128>}]} {
    %c0 = arith.constant 0 : index
    %c0_0 = arith.constant 0 : index
    %0 = vector.load %arg3[%c0, %c0_0] : memref<1x2944xf32, #tpu.memory_space<vmem>>, vector<1x1024xf32>
    %c0_1 = arith.constant 0 : index
    %c1024 = arith.constant 1024 : index
    %1 = vector.load %arg3[%c0_1, %c1024] : memref<1x2944xf32, #tpu.memory_space<vmem>>, vector<1x512xf32>
    %c0_2 = arith.constant 0 : index
    %c1536 = arith.constant 1536 : index
    %2 = vector.load %arg3[%c0_2, %c1536] : memref<1x2944xf32, #tpu.memory_space<vmem>>, vector<1x512xf32>
    %c0_3 = arith.constant 0 : index
    %c2048 = arith.constant 2048 : index
    %3 = vector.load %arg3[%c0_3, %c2048] : memref<1x2944xf32, #tpu.memory_space<vmem>>, vector<1x128xf32>
    %c0_4 = arith.constant 0 : index
    %c2176 = arith.constant 2176 : index
    %4 = vector.load %arg3[%c0_4, %c2176] : memref<1x2944xf32, #tpu.memory_space<vmem>>, vector<1x512xf32>
    %c0_5 = arith.constant 0 : index
    %c2688 = arith.constant 2688 : index
    %5 = vector.load %arg3[%c0_5, %c2688] : memref<1x2944xf32, #tpu.memory_space<vmem>>, vector<1x128xf32>
    %c0_6 = arith.constant 0 : index
    %c2816 = arith.constant 2816 : index
    %6 = vector.load %arg3[%c0_6, %c2816] : memref<1x2944xf32, #tpu.memory_space<vmem>>, vector<1x128xf32>
    %c0_7 = arith.constant 0 : index
    %c0_8 = arith.constant 0 : index
    %7 = vector.load %arg1[%c0_7, %c0_8] : memref<8x32xf32, #tpu.memory_space<vmem>>, vector<8x32xf32>
    %c0_9 = arith.constant 0 : index
    %c0_10 = arith.constant 0 : index
    %8 = vector.load %arg2[%c0_9, %c0_10] : memref<8x128xf32, #tpu.memory_space<vmem>>, vector<8x128xf32>
    %9 = arith.truncf %7 : vector<8x32xf32> to vector<8x32xbf16>
    %c0_11 = arith.constant 0 : index
    %c0_12 = arith.constant 0 : index
    %10 = vector.load %arg4[%c0_11, %c0_12] : memref<32x1024xbf16, #tpu.memory_space<vmem>>, vector<32x1024xbf16>
    %cst = arith.constant dense<0.000000e+00> : vector<8x1024xf32>
    %11 = tpu.matmul %9, %10, %cst {dimension_numbers = #tpu.dot_dimension_numbers<[1], [0], [0], [1], [0, 0, 1, 1], [], []>} : vector<8x32xbf16>, vector<32x1024xbf16>, vector<8x1024xf32> -> vector<8x1024xf32>
    %12 = vector.broadcast %0 : vector<1x1024xf32> to vector<8x1024xf32>
    %13 = arith.addf %11, %12 : vector<8x1024xf32>
    %cst_13 = arith.constant 0.000000e+00 : f32
    %14 = vector.broadcast %cst_13 : f32 to vector<8x1024xf32>
    %15 = arith.maximumf %13, %14 : vector<8x1024xf32>
    %16 = vector.extract_strided_slice %15 {offsets = [0, 0], sizes = [8, 512], strides = [1, 1]} : vector<8x1024xf32> to vector<8x512xf32>
    %17 = vector.extract_strided_slice %15 {offsets = [0, 512], sizes = [8, 512], strides = [1, 1]} : vector<8x1024xf32> to vector<8x512xf32>
    %18 = arith.truncf %16 : vector<8x512xf32> to vector<8x512xbf16>
    %c0_14 = arith.constant 0 : index
    %c0_15 = arith.constant 0 : index
    %19 = vector.load %arg5[%c0_14, %c0_15] : memref<512x512xbf16, #tpu.memory_space<vmem>>, vector<512x512xbf16>
    %cst_16 = arith.constant dense<0.000000e+00> : vector<8x512xf32>
    %20 = tpu.matmul %18, %19, %cst_16 {dimension_numbers = #tpu.dot_dimension_numbers<[1], [0], [0], [1], [0, 0, 1, 1], [], []>} : vector<8x512xbf16>, vector<512x512xbf16>, vector<8x512xf32> -> vector<8x512xf32>
    %21 = vector.broadcast %1 : vector<1x512xf32> to vector<8x512xf32>
    %22 = arith.addf %20, %21 : vector<8x512xf32>
    %cst_17 = arith.constant 0.000000e+00 : f32
    %23 = vector.broadcast %cst_17 : f32 to vector<8x512xf32>
    %24 = arith.maximumf %22, %23 : vector<8x512xf32>
    %25 = arith.truncf %24 : vector<8x512xf32> to vector<8x512xbf16>
    %c0_18 = arith.constant 0 : index
    %c0_19 = arith.constant 0 : index
    %26 = vector.load %arg7[%c0_18, %c0_19] : memref<512x128xbf16, #tpu.memory_space<vmem>>, vector<512x128xbf16>
    %cst_20 = arith.constant dense<0.000000e+00> : vector<8x128xf32>
    %27 = tpu.matmul %25, %26, %cst_20 {dimension_numbers = #tpu.dot_dimension_numbers<[1], [0], [0], [1], [0, 0, 1, 1], [], []>} : vector<8x512xbf16>, vector<512x128xbf16>, vector<8x128xf32> -> vector<8x128xf32>
    %28 = vector.broadcast %3 : vector<1x128xf32> to vector<8x128xf32>
    %29 = arith.addf %27, %28 : vector<8x128xf32>
    %30 = arith.truncf %17 : vector<8x512xf32> to vector<8x512xbf16>
    %c0_21 = arith.constant 0 : index
    %c0_22 = arith.constant 0 : index
    %31 = vector.load %arg6[%c0_21, %c0_22] : memref<512x512xbf16, #tpu.memory_space<vmem>>, vector<512x512xbf16>
    %cst_23 = arith.constant dense<0.000000e+00> : vector<8x512xf32>
    %32 = tpu.matmul %30, %31, %cst_23 {dimension_numbers = #tpu.dot_dimension_numbers<[1], [0], [0], [1], [0, 0, 1, 1], [], []>} : vector<8x512xbf16>, vector<512x512xbf16>, vector<8x512xf32> -> vector<8x512xf32>
    %33 = vector.broadcast %2 : vector<1x512xf32> to vector<8x512xf32>
    %34 = arith.addf %32, %33 : vector<8x512xf32>
    %cst_24 = arith.constant 0.000000e+00 : f32
    %35 = vector.broadcast %cst_24 : f32 to vector<8x512xf32>
    %36 = arith.maximumf %34, %35 : vector<8x512xf32>
    %37 = vector.broadcast %4 : vector<1x512xf32> to vector<8x512xf32>
    %38 = arith.mulf %36, %37 : vector<8x512xf32>
    %cst_25 = arith.constant dense<0.000000e+00> : vector<8xf32>
    %39 = vector.multi_reduction <add>, %38, %cst_25 [1] : vector<8x512xf32> to vector<8xf32>
    %40 = vector.shape_cast %39 : vector<8xf32> to vector<8x1xf32>
    %41 = arith.subf %8, %29 : vector<8x128xf32>
    %42 = arith.mulf %41, %41 : vector<8x128xf32>
    %43 = vector.broadcast %5 : vector<1x128xf32> to vector<8x128xf32>
    %44 = arith.mulf %42, %43 : vector<8x128xf32>
    %cst_26 = arith.constant dense<0.000000e+00> : vector<8xf32>
    %45 = vector.multi_reduction <add>, %44, %cst_26 [1] : vector<8x128xf32> to vector<8xf32>
    %46 = vector.shape_cast %45 : vector<8xf32> to vector<8x1xf32>
    %47 = tpu.iota {dimensions = array<i32: 1>} : vector<8x128xi32>
    %c4_i32 = arith.constant 4 : i32
    %48 = vector.broadcast %c4_i32 : i32 to vector<8x128xi32>
    %49 = arith.cmpi eq, %47, %48 : vector<8x128xi32>
    %cst_27 = arith.constant -5.000000e-01 : f32
    %50 = vector.broadcast %cst_27 : f32 to vector<8x1xf32>
    %51 = arith.mulf %50, %46 : vector<8x1xf32>
    %c5_i32 = arith.constant 5 : i32
    %52 = vector.broadcast %c5_i32 : i32 to vector<8x128xi32>
    %53 = arith.cmpi eq, %47, %52 : vector<8x128xi32>
    %cst_28 = arith.constant 0.000000e+00 : f32
    %54 = vector.shape_cast %40 : vector<8x1xf32> to vector<8x1xf32>
    %55 = vector.broadcast %54 : vector<8x1xf32> to vector<8x128xf32>
    %56 = vector.broadcast %cst_28 : f32 to vector<8x128xf32>
    %57 = arith.select %53, %55, %56 : vector<8x128xi1>, vector<8x128xf32>
    %58 = vector.shape_cast %51 : vector<8x1xf32> to vector<8x1xf32>
    %59 = vector.broadcast %58 : vector<8x1xf32> to vector<8x128xf32>
    %60 = arith.select %49, %59, %57 : vector<8x128xi1>, vector<8x128xf32>
    %61 = vector.broadcast %6 : vector<1x128xf32> to vector<8x128xf32>
    %62 = arith.addf %29, %61 : vector<8x128xf32>
    %63 = arith.addf %62, %60 : vector<8x128xf32>
    %c0_29 = arith.constant 0 : index
    %c0_30 = arith.constant 0 : index
    %64 = vector.load %arg8[%c0_29, %c0_30] : memref<8x128xf32, #tpu.memory_space<vmem>>, vector<8x128xf32>
    tpu.vector_store %arg8[%c0_29, %c0_30], %63 {strides = array<i32>} : memref<8x128xf32, #tpu.memory_space<vmem>>, vector<8x128xf32>,
    return
  }
  func.func @transform_0(%arg0: i32) -> (i32, i32) {
    %c0_i32 = arith.constant 0 : i32
    %c0_i32_0 = arith.constant 0 : i32
    return %arg0, %c0_i32 : i32, i32
  }
  func.func @transform_1(%arg0: i32) -> (i32, i32) {
    %c0_i32 = arith.constant 0 : i32
    %c0_i32_0 = arith.constant 0 : i32
    return %arg0, %c0_i32 : i32, i32
  }
  func.func @transform_2(%arg0: i32) -> (i32, i32) {
    %c0_i32 = arith.constant 0 : i32
    %c0_i32_0 = arith.constant 0 : i32
    %c0_i32_1 = arith.constant 0 : i32
    return %c0_i32, %c0_i32_0 : i32, i32
  }
  func.func @transform_3(%arg0: i32) -> (i32, i32) {
    %c0_i32 = arith.constant 0 : i32
    %c0_i32_0 = arith.constant 0 : i32
    %c0_i32_1 = arith.constant 0 : i32
    return %c0_i32, %c0_i32_0 : i32, i32
  }
  func.func @transform_4(%arg0: i32) -> (i32, i32) {
    %c0_i32 = arith.constant 0 : i32
    %c0_i32_0 = arith.constant 0 : i32
    %c0_i32_1 = arith.constant 0 : i32
    return %c0_i32, %c0_i32_0 : i32, i32
  }
  func.func @transform_5(%arg0: i32) -> (i32, i32) {
    %c0_i32 = arith.constant 0 : i32
    %c0_i32_0 = arith.constant 0 : i32
    %c0_i32_1 = arith.constant 0 : i32
    return %c0_i32, %c0_i32_0 : i32, i32
  }
  func.func @transform_6(%arg0: i32) -> (i32, i32) {
    %c0_i32 = arith.constant 0 : i32
    %c0_i32_0 = arith.constant 0 : i32
    %c0_i32_1 = arith.constant 0 : i32
    return %c0_i32, %c0_i32_0 : i32, i32
  }
  func.func @transform_7(%arg0: i32) -> (i32, i32) {
    %c0_i32 = arith.constant 0 : i32
    %c0_i32_0 = arith.constant 0 : i32
    return %arg0, %c0_i32 : i32, i32
  }
}

</mosaic_0001>

<bundles_post_ra>
// kernel: actor_critic_evaluate.1
= control target key start
LH: loop header
LB: loop body
LE: loop exit
PB: predicated region body
PF: predicated region fallthrough
CT: control target
= control target key end

     0   :  { %v3452_v3 = vmov 0   ;;  %vm174_vm0 = vcmask 261120   ;;  %s4529_s3 = inlined_call_operand.vmem [shape: bf16[32,1024], index: 3, kind: input, shape index: {}]   ;;  %s4530_s0 = inlined_call_operand.vmem [shape: f32[8,32], index: 0, kind: input, shape index: {}]   ;;  %s4531_s4 = inlined_call_operand.vmem [shape: bf16[512,512], index: 4, kind: input, shape index: {}]   ;;  %s4532_s6 = inlined_call_operand.vmem [shape: bf16[512,128], index: 6, kind: input, shape index: {}]   ;;  %s4533_s2 = inlined_call_operand.vmem [shape: f32[1,2944], index: 2, kind: input, shape index: {}]   ;;  %s4534_s5 = inlined_call_operand.vmem [shape: bf16[512,512], index: 5, kind: input, shape index: {}]   ;;  %s4535_s1 = inlined_call_operand.vmem [shape: f32[8,128], index: 1, kind: input, shape index: {}]   ;;  %s4536_s7 = inlined_call_operand.vmem [shape: f32[8,128], index: 7, kind: output, shape index: {}]  }
   0x1   :  { %v45_v0 = vld [vmem:[%s4529_s3 + $0x40] sm:$0xff]  ;;  %v46_v2 = vld [vmem:[%s4529_s3 + $0x48] sm:$0xff]  ;;  %210 = vmatprep.mubr.bf16.mxu0 %v3452_v3  ;;  %251 = vmatprep.mubr.bf16.mxu1 %v3452_v3  ;;  %v47_v15 = vld [vmem:[%s4529_s3 + $0x50] sm:$0xff] }
   0x2   :  { %v49_v1 = vld [vmem:[%s4529_s3 + $0x60] sm:$0xff]  ;;  %v50_v5 = vld [vmem:[%s4529_s3 + $0x68] sm:$0xff]  ;;  %v51_v16 = vld [vmem:[%s4529_s3 + $0x70] sm:$0xff] }
   0x3   :  { %v2688_v4 = vcombine.high %v45_v0, %v49_v1  ;;  %v2687_v6 = vcombine.low %v45_v0, %v49_v1  ;;  %v37_v7 = vld [vmem:[%s4529_s3] sm:$0xff]  ;;  %v2690_v9 = vcombine.high %v46_v2, %v50_v5  ;;  %v2689_v10 = vcombine.low %v46_v2, %v50_v5  ;;  %v38_v12 = vld [vmem:[%s4529_s3 + $0x8] sm:$0xff]  ;;  %v48_v17 = vld [vmem:[%s4529_s3 + $0x58] sm:$0xff] }
   0x4   :  { %v41_v8 = vld [vmem:[%s4529_s3 + $0x20] sm:$0xff]  ;;  %v42_v13 = vld [vmem:[%s4529_s3 + $0x28] sm:$0xff]  ;;  %v52_v20 = vld [vmem:[%s4529_s3 + $0x78] sm:$0xff]  ;;  %v2692_v22 = vcombine.high %v47_v15, %v51_v16  ;;  %v2691_v29 = vcombine.low %v47_v15, %v51_v16 }
   0x5   :  { %v2680_v11 = vcombine.high %v37_v7, %v41_v8  ;;  %190 = vmatprep.subr.bf16.mxu0 %v2688_v4  ;;  %v2682_v14 = vcombine.high %v38_v12, %v42_v13  ;;  %231 = vmatprep.subr.bf16.mxu1 %v2690_v9  ;;  %v2679_v18 = vcombine.low %v37_v7, %v41_v8  ;;  %v34_v19 = vld [vmem:[%s4530_s0] sm:$0xff]  ;;  %v39_v23 = vld [vmem:[%s4529_s3 + $0x10] sm:$0xff]  ;;  %v40_v26 = vld [vmem:[%s4529_s3 + $0x18] sm:$0xff] }
   0x6   :  { %191 = vmatpush1.bf16.msra.mxu0 %v2687_v6  ;;  %232 = vmatpush1.bf16.msra.mxu1 %v2689_v10  ;;  %v2681_v21 = vcombine.low %v38_v12, %v42_v13  ;;  %v2694_v24 = vcombine.high %v48_v17, %v52_v20  ;;  %v43_v25 = vld [vmem:[%s4529_s3 + $0x30] sm:$0xff]  ;;  %v36_v27 = vpack.c.bf16 %v34_v19, %v34_v19  ;;  %v44_v28 = vld [vmem:[%s4529_s3 + $0x38] sm:$0xff] }
   0x7   :  { %192 = vmatprep.subr.bf16.mxu0 %v2680_v11  ;;  %233 = vmatprep.subr.bf16.mxu1 %v2682_v14  ;;  %v2693_v30 = vcombine.low %v48_v17, %v52_v20  ;;  %v2684_v31 = vcombine.high %v39_v23, %v43_v25  ;;  %v2686_v32 = vcombine.high %v40_v26, %v44_v28  ;;  %v3037_v35 = vld [vmem:[%s4531_s4 + $0xe4] ss:$16 sps:$4 sm:$0xff]   ;;  %v3035_v37 = vld [vmem:[%s4531_s4 + $0xe0] ss:$16 sps:$4 sm:$0xff]  }
   0x8   :  { %v2683_v33 = vcombine.low %v39_v23, %v43_v25  ;;  %v2685_v34 = vcombine.low %v40_v26, %v44_v28  ;;  %v3040_v36 = vld [vmem:[%s4531_s4 + $0x2e4] ss:$16 sps:$4 sm:$0xff]   ;;  %v3038_v38 = vld [vmem:[%s4531_s4 + $0x2e0] ss:$16 sps:$4 sm:$0xff]  }
   0x9   :  { %v3043_v39 = vld [vmem:[%s4531_s4 + $0xc4] ss:$16 sps:$4 sm:$0xff]   ;;  %v3041_v41 = vld [vmem:[%s4531_s4 + $0xc0] ss:$16 sps:$4 sm:$0xff]  }
   0xa   :  { %193 = vmatpush1.bf16.msra.mxu0 %v2679_v18  ;;  %234 = vmatpush1.bf16.msra.mxu1 %v2681_v21  ;;  %v3046_v40 = vld [vmem:[%s4531_s4 + $0x2c4] ss:$16 sps:$4 sm:$0xff]   ;;  %v3044_v42 = vld [vmem:[%s4531_s4 + $0x2c0] ss:$16 sps:$4 sm:$0xff]  }
   0xb   :  { %272 = vmatprep.subr.bf16.mxu0 %v2692_v22  ;;  %313 = vmatprep.subr.bf16.mxu1 %v2694_v24  ;;  %v3049_v43 = vld [vmem:[%s4531_s4 + $0xa4] ss:$16 sps:$4 sm:$0xff]   ;;  %v3047_v45 = vld [vmem:[%s4531_s4 + $0xa0] ss:$16 sps:$4 sm:$0xff]  }
   0xc   :  { %v3052_v44 = vld [vmem:[%s4531_s4 + $0x2a4] ss:$16 sps:$4 sm:$0xff]   ;;  %v3050_v46 = vld [vmem:[%s4531_s4 + $0x2a0] ss:$16 sps:$4 sm:$0xff]  }
   0xd   :  { %2695 = vmatmul.mubr.msk.bf16.vlgmr.msra.gmra.mxu0 %vm174_vm0, %v36_v27  ;;  %2696 = vmatmul.mubr.msk.bf16.vlgmr.msra.gmra.mxu1 %vm174_vm0, %v36_v27  ;;  %v3055_v47 = vld [vmem:[%s4531_s4 + $0x84] ss:$16 sps:$4 sm:$0xff]   ;;  %v3053_v49 = vld [vmem:[%s4531_s4 + $0x80] ss:$16 sps:$4 sm:$0xff]  }
   0xe   :  { %273 = vmatpush1.bf16.msra.mxu0 %v2691_v29  ;;  %314 = vmatpush1.bf16.msra.mxu1 %v2693_v30  ;;  %v3058_v48 = vld [vmem:[%s4531_s4 + $0x284] ss:$16 sps:$4 sm:$0xff]   ;;  %v3056_v50 = vld [vmem:[%s4531_s4 + $0x280] ss:$16 sps:$4 sm:$0xff]  }
   0xf   :  { %274 = vmatprep.subr.bf16.mxu0 %v2684_v31  ;;  %315 = vmatprep.subr.bf16.mxu1 %v2686_v32  ;;  %v3061_v51 = vld [vmem:[%s4531_s4 + $0x64] ss:$16 sps:$4 sm:$0xff]   ;;  %v3059_v53 = vld [vmem:[%s4531_s4 + $0x60] ss:$16 sps:$4 sm:$0xff]  }
  0x10   :  { %292 = vmatprep.mubr.bf16.mxu0 %v3452_v3  ;;  %333 = vmatprep.mubr.bf16.mxu1 %v3452_v3  ;;  %v3064_v52 = vld [vmem:[%s4531_s4 + $0x264] ss:$16 sps:$4 sm:$0xff]   ;;  %v3062_v54 = vld [vmem:[%s4531_s4 + $0x260] ss:$16 sps:$4 sm:$0xff]  }
  0x11   :  { %v3067_v55 = vld [vmem:[%s4531_s4 + $0x44] ss:$16 sps:$4 sm:$0xff]   ;;  %v3065_v57 = vld [vmem:[%s4531_s4 + $0x40] ss:$16 sps:$4 sm:$0xff]  }
  0x12   :  { %275 = vmatpush1.bf16.msra.mxu0 %v2683_v33  ;;  %316 = vmatpush1.bf16.msra.mxu1 %v2685_v34  ;;  %v3070_v56 = vld [vmem:[%s4531_s4 + $0x244] ss:$16 sps:$4 sm:$0xff]   ;;  %v3068_v58 = vld [vmem:[%s4531_s4 + $0x240] ss:$16 sps:$4 sm:$0xff]  }
  0x13   :  { %1143 = vmatprep.subr.bf16.mxu0 %v3037_v35  ;;  %1184 = vmatprep.subr.bf16.mxu1 %v3040_v36  ;;  %v3073_v59 = vld [vmem:[%s4531_s4 + $0x24] ss:$16 sps:$4 sm:$0xff]   ;;  %v3071_v61 = vld [vmem:[%s4531_s4 + $0x20] ss:$16 sps:$4 sm:$0xff]   ;;  %v3133_v35 = vld [vmem:[%s4531_s4 + $0xec] ss:$16 sps:$4 sm:$0xff]  }
  0x14   :  { %v3076_v60 = vld [vmem:[%s4531_s4 + $0x224] ss:$16 sps:$4 sm:$0xff]   ;;  %v3074_v62 = vld [vmem:[%s4531_s4 + $0x220] ss:$16 sps:$4 sm:$0xff]   ;;  %v3136_v36 = vld [vmem:[%s4531_s4 + $0x2ec] ss:$16 sps:$4 sm:$0xff]  }
  0x15   :  { %2697 = vmatmul.mubr.msk.bf16.vlgmr.msra.gmra.mxu0 %vm174_vm0, %v36_v27  ;;  %2698 = vmatmul.mubr.msk.bf16.vlgmr.msra.gmra.mxu1 %vm174_vm0, %v36_v27  ;;  %v3079_v63 = vld [vmem:[%s4531_s4 + $0x4] ss:$16 sps:$4 sm:$0xff]   ;;  %v3077_v0 = vld [vmem:[%s4531_s4] ss:$16 sps:$4 sm:$0xff]  }
  0x16   :  { %1144 = vmatpush1.bf16.msra.mxu0 %v3035_v37  ;;  %1185 = vmatpush1.bf16.msra.mxu1 %v3038_v38  ;;  %v3082_v1 = vld [vmem:[%s4531_s4 + $0x204] ss:$16 sps:$4 sm:$0xff]   ;;  %v3080_v2 = vld [vmem:[%s4531_s4 + $0x200] ss:$16 sps:$4 sm:$0xff]   ;;  %v54_v37 = vlaneseq }
  0x17   :  { %1145 = vmatprep.subr.bf16.mxu0 %v3043_v39  ;;  %1186 = vmatprep.subr.bf16.mxu1 %v3046_v40  ;;  %v3085_v3 = vld [vmem:[%s4531_s4 + $0x1e4] ss:$16 sps:$4 sm:$0xff]   ;;  %v3083_v5 = vld [vmem:[%s4531_s4 + $0x1e0] ss:$16 sps:$4 sm:$0xff]  }
  0x18   :  { %v3088_v4 = vld [vmem:[%s4531_s4 + $0x3e4] ss:$16 sps:$4 sm:$0xff]   ;;  %v3086_v6 = vld [vmem:[%s4531_s4 + $0x3e0] ss:$16 sps:$4 sm:$0xff]   ;;  %v3747_v38 = vshrl.u32 %v54_v37, 7 }
  0x19   :  { %v3091_v7 = vld [vmem:[%s4531_s4 + $0x1c4] ss:$16 sps:$4 sm:$0xff]   ;;  %v3089_v9 = vld [vmem:[%s4531_s4 + $0x1c0] ss:$16 sps:$4 sm:$0xff]  }
  0x1a   :  { %1146 = vmatpush1.bf16.msra.mxu0 %v3041_v41  ;;  %1187 = vmatpush1.bf16.msra.mxu1 %v3044_v42  ;;  %v3094_v8 = vld [vmem:[%s4531_s4 + $0x3c4] ss:$16 sps:$4 sm:$0xff]   ;;  %v3092_v10 = vld [vmem:[%s4531_s4 + $0x3c0] ss:$16 sps:$4 sm:$0xff]   ;;  %v3750_v39 = vsub.s32 0, %v3747_v38  ;;  %v3758_v41 = vsub.s32 2, %v3747_v38 }
  0x1b   :  { %1147 = vmatprep.subr.bf16.mxu0 %v3049_v43  ;;  %1188 = vmatprep.subr.bf16.mxu1 %v3052_v44  ;;  %v3097_v11 = vld [vmem:[%s4531_s4 + $0x1a4] ss:$16 sps:$4 sm:$0xff]   ;;  %v3095_v13 = vld [vmem:[%s4531_s4 + $0x1a0] ss:$16 sps:$4 sm:$0xff]   ;;  %v3761_v42 = vsub.s32 1, %v3747_v38  ;;  %v3764_v43 = vsub.s32 3, %v3747_v38 }
  0x1c   :  { %v3100_v12 = vld [vmem:[%s4531_s4 + $0x3a4] ss:$16 sps:$4 sm:$0xff]   ;;  %v3098_v14 = vld [vmem:[%s4531_s4 + $0x3a0] ss:$16 sps:$4 sm:$0xff]  }
  0x1d   :  { %v3103_v15 = vld [vmem:[%s4531_s4 + $0x184] ss:$16 sps:$4 sm:$0xff]   ;;  %v3101_v17 = vld [vmem:[%s4531_s4 + $0x180] ss:$16 sps:$4 sm:$0xff]  }
  0x1e   :  { %1148 = vmatpush1.bf16.msra.mxu0 %v3047_v45  ;;  %1189 = vmatpush1.bf16.msra.mxu1 %v3050_v46  ;;  %v3106_v16 = vld [vmem:[%s4531_s4 + $0x384] ss:$16 sps:$4 sm:$0xff]   ;;  %v3104_v18 = vld [vmem:[%s4531_s4 + $0x380] ss:$16 sps:$4 sm:$0xff]  }
  0x1f   :  { %1149 = vmatprep.subr.bf16.mxu0 %v3055_v47  ;;  %1190 = vmatprep.subr.bf16.mxu1 %v3058_v48  ;;  %v3109_v19 = vld [vmem:[%s4531_s4 + $0x164] ss:$16 sps:$4 sm:$0xff]   ;;  %v3107_v21 = vld [vmem:[%s4531_s4 + $0x160] ss:$16 sps:$4 sm:$0xff]  }
  0x20   :  { %v3112_v20 = vld [vmem:[%s4531_s4 + $0x364] ss:$16 sps:$4 sm:$0xff]   ;;  %v3110_v22 = vld [vmem:[%s4531_s4 + $0x360] ss:$16 sps:$4 sm:$0xff]  }
  0x21   :  { %v3115_v23 = vld [vmem:[%s4531_s4 + $0x144] ss:$16 sps:$4 sm:$0xff]   ;;  %v3113_v25 = vld [vmem:[%s4531_s4 + $0x140] ss:$16 sps:$4 sm:$0xff]  }
  0x22   :  { %1150 = vmatpush1.bf16.msra.mxu0 %v3053_v49  ;;  %1191 = vmatpush1.bf16.msra.mxu1 %v3056_v50  ;;  %v3118_v24 = vld [vmem:[%s4531_s4 + $0x344] ss:$16 sps:$4 sm:$0xff]   ;;  %v3116_v26 = vld [vmem:[%s4531_s4 + $0x340] ss:$16 sps:$4 sm:$0xff]  }
  0x23   :  { %1151 = vmatprep.subr.bf16.mxu0 %v3061_v51  ;;  %1192 = vmatprep.subr.bf16.mxu1 %v3064_v52  ;;  %v3121_v27 = vld [vmem:[%s4531_s4 + $0x124] ss:$16 sps:$4 sm:$0xff]   ;;  %v3119_v29 = vld [vmem:[%s4531_s4 + $0x120] ss:$16 sps:$4 sm:$0xff]  }
  0x24   :  { %v3124_v28 = vld [vmem:[%s4531_s4 + $0x324] ss:$16 sps:$4 sm:$0xff]   ;;  %v3122_v30 = vld [vmem:[%s4531_s4 + $0x320] ss:$16 sps:$4 sm:$0xff]  }
  0x25   :  { %v3127_v31 = vld [vmem:[%s4531_s4 + $0x104] ss:$16 sps:$4 sm:$0xff]   ;;  %v3125_v33 = vld [vmem:[%s4531_s4 + $0x100] ss:$16 sps:$4 sm:$0xff]  }
  0x26   :  { %1152 = vmatpush1.bf16.msra.mxu0 %v3059_v53  ;;  %1193 = vmatpush1.bf16.msra.mxu1 %v3062_v54  ;;  %v3130_v32 = vld [vmem:[%s4531_s4 + $0x304] ss:$16 sps:$4 sm:$0xff]   ;;  %v3128_v34 = vld [vmem:[%s4531_s4 + $0x300] ss:$16 sps:$4 sm:$0xff]  }
  0x27   :  { %1153 = vmatprep.subr.bf16.mxu0 %v3067_v55  ;;  %1194 = vmatprep.subr.bf16.mxu1 %v3070_v56  ;;  %v3755_v40 = vld [vmem:[%s4533_s2] sm:$0xff] }
  0x28   :  { %v57_v44 = vrot.slane %v3755_v40, %v3750_v39  ;;  %v65_v45 = vrot.slane %v3755_v40, %v3758_v41  ;;  %v61_v46 = vrot.slane %v3755_v40, %v3761_v42  ;;  %v69_v48 = vrot.slane %v3755_v40, %v3764_v43 }
  0x2a   :  { %1154 = vmatpush1.bf16.msra.mxu0 %v3065_v57  ;;  %1195 = vmatpush1.bf16.msra.mxu1 %v3068_v58 }
  0x2b   :  { %1155 = vmatprep.subr.bf16.mxu0 %v3073_v59  ;;  %1196 = vmatprep.subr.bf16.mxu1 %v3076_v60 }
  0x2e   :  { %1156 = vmatpush1.bf16.msra.mxu0 %v3071_v61  ;;  %1197 = vmatpush1.bf16.msra.mxu1 %v3074_v62 }
  0x2f   :  { %1157 = vmatprep.subr.bf16.mxu0 %v3079_v63  ;;  %1198 = vmatprep.subr.bf16.mxu1 %v3082_v1 }
  0x32   :  { %1158 = vmatpush1.bf16.msra.mxu0 %v3077_v0  ;;  %1199 = vmatpush1.bf16.msra.mxu1 %v3080_v2  ;;  %v3131_v2 = vld [vmem:[%s4531_s4 + $0xe8] ss:$16 sps:$4 sm:$0xff]  }
  0x33   :  { %1159 = vmatprep.subr.bf16.mxu0 %v3085_v3  ;;  %1200 = vmatprep.subr.bf16.mxu1 %v3088_v4 }
  0x36   :  { %1160 = vmatpush2.bf16.msra.mxu0 %v3083_v5  ;;  %1201 = vmatpush2.bf16.msra.mxu1 %v3086_v6  ;;  %v3134_v5 = vld [vmem:[%s4531_s4 + $0x2e8] ss:$16 sps:$4 sm:$0xff]  }
  0x37   :  { %1161 = vmatprep.subr.bf16.mxu0 %v3091_v7  ;;  %1202 = vmatprep.subr.bf16.mxu1 %v3094_v8  ;;  %v3139_v7 = vld [vmem:[%s4531_s4 + $0xcc] ss:$16 sps:$4 sm:$0xff]  }
  0x3a   :  { %1162 = vmatpush2.bf16.msra.mxu0 %v3089_v9  ;;  %1203 = vmatpush2.bf16.msra.mxu1 %v3092_v10  ;;  %v3142_v9 = vld [vmem:[%s4531_s4 + $0x2cc] ss:$16 sps:$4 sm:$0xff]  }
  0x3b   :  { %1163 = vmatprep.subr.bf16.mxu0 %v3097_v11  ;;  %1204 = vmatprep.subr.bf16.mxu1 %v3100_v12  ;;  %v3137_v11 = vld [vmem:[%s4531_s4 + $0xc8] ss:$16 sps:$4 sm:$0xff]  }
  0x3e   :  { %1164 = vmatpush2.bf16.msra.mxu0 %v3095_v13  ;;  %1205 = vmatpush2.bf16.msra.mxu1 %v3098_v14  ;;  %v3140_v13 = vld [vmem:[%s4531_s4 + $0x2c8] ss:$16 sps:$4 sm:$0xff]   ;;  %v3145_v14 = vld [vmem:[%s4531_s4 + $0xac] ss:$16 sps:$4 sm:$0xff]  }
  0x3f   :  { %1165 = vmatprep.subr.bf16.mxu0 %v3103_v15  ;;  %1206 = vmatprep.subr.bf16.mxu1 %v3106_v16  ;;  %v3148_v16 = vld [vmem:[%s4531_s4 + $0x2ac] ss:$16 sps:$4 sm:$0xff]  }
  0x42   :  { %1166 = vmatpush2.bf16.msra.mxu0 %v3101_v17  ;;  %1207 = vmatpush2.bf16.msra.mxu1 %v3104_v18 }
  0x43   :  { %1167 = vmatprep.subr.bf16.mxu0 %v3109_v19  ;;  %1208 = vmatprep.subr.bf16.mxu1 %v3112_v20  ;;  %v3143_v19 = vld [vmem:[%s4531_s4 + $0xa8] ss:$16 sps:$4 sm:$0xff]  }
  0x46   :  { %1168 = vmatpush2.bf16.msra.mxu0 %v3107_v21  ;;  %1209 = vmatpush2.bf16.msra.mxu1 %v3110_v22  ;;  %v3146_v21 = vld [vmem:[%s4531_s4 + $0x2a8] ss:$16 sps:$4 sm:$0xff]   ;;  %v3151_v22 = vld [vmem:[%s4531_s4 + $0x8c] ss:$16 sps:$4 sm:$0xff]  }
  0x47   :  { %1169 = vmatprep.subr.bf16.mxu0 %v3115_v23  ;;  %1210 = vmatprep.subr.bf16.mxu1 %v3118_v24  ;;  %v3154_v23 = vld [vmem:[%s4531_s4 + $0x28c] ss:$16 sps:$4 sm:$0xff]   ;;  %v3149_v24 = vld [vmem:[%s4531_s4 + $0x88] ss:$16 sps:$4 sm:$0xff]  }
  0x4a   :  { %1170 = vmatpush2.bf16.msra.mxu0 %v3113_v25  ;;  %1211 = vmatpush2.bf16.msra.mxu1 %v3116_v26  ;;  %v3152_v25 = vld [vmem:[%s4531_s4 + $0x288] ss:$16 sps:$4 sm:$0xff]   ;;  %v3157_v26 = vld [vmem:[%s4531_s4 + $0x6c] ss:$16 sps:$4 sm:$0xff]  }
  0x4b   :  { %1171 = vmatprep.subr.bf16.mxu0 %v3121_v27  ;;  %1212 = vmatprep.subr.bf16.mxu1 %v3124_v28  ;;  %v3160_v27 = vld [vmem:[%s4531_s4 + $0x26c] ss:$16 sps:$4 sm:$0xff]   ;;  %v3155_v28 = vld [vmem:[%s4531_s4 + $0x68] ss:$16 sps:$4 sm:$0xff]  }
  0x4e   :  { %1172 = vmatpush2.bf16.msra.mxu0 %v3119_v29  ;;  %1213 = vmatpush2.bf16.msra.mxu1 %v3122_v30  ;;  %v3158_v29 = vld [vmem:[%s4531_s4 + $0x268] ss:$16 sps:$4 sm:$0xff]   ;;  %v3163_v30 = vld [vmem:[%s4531_s4 + $0x4c] ss:$16 sps:$4 sm:$0xff]  }
  0x4f   :  { %1173 = vmatprep.subr.bf16.mxu0 %v3127_v31  ;;  %1214 = vmatprep.subr.bf16.mxu1 %v3130_v32  ;;  %v3166_v31 = vld [vmem:[%s4531_s4 + $0x24c] ss:$16 sps:$4 sm:$0xff]   ;;  %v3161_v32 = vld [vmem:[%s4531_s4 + $0x48] ss:$16 sps:$4 sm:$0xff]  }
  0x52   :  { %1174 = vmatpush2.bf16.msra.mxu0 %v3125_v33  ;;  %1215 = vmatpush2.bf16.msra.mxu1 %v3128_v34  ;;  %v3164_v33 = vld [vmem:[%s4531_s4 + $0x248] ss:$16 sps:$4 sm:$0xff]   ;;  %v3169_v34 = vld [vmem:[%s4531_s4 + $0x2c] ss:$16 sps:$4 sm:$0xff]  }
  0x53   :  { %1225 = vmatprep.subr.bf16.mxu0 %v3133_v35  ;;  %1266 = vmatprep.subr.bf16.mxu1 %v3136_v36  ;;  %v3172_v35 = vld [vmem:[%s4531_s4 + $0x22c] ss:$16 sps:$4 sm:$0xff]   ;;  %v3167_v36 = vld [vmem:[%s4531_s4 + $0x28] ss:$16 sps:$4 sm:$0xff]  }
  0xcd   :  { %v212_v47 = vpop.f32.mrf.mxu0  ;;  %v253_v50 = vpop.f32.mrf.mxu1 }
  0xce   :  { %v213_v49 = vadd.f32 %v212_v47, %v57_v44  ;;  %v254_v51 = vadd.f32 %v253_v50, %v65_v45  ;;  %v3170_v44 = vld [vmem:[%s4531_s4 + $0x228] ss:$16 sps:$4 sm:$0xff]   ;;  %v3175_v45 = vld [vmem:[%s4531_s4 + $0xc] ss:$16 sps:$4 sm:$0xff]  }
  0xcf   :  { %v214_v52 = vpop.f32.mrf.mxu0  ;;  %v255_v54 = vpop.f32.mrf.mxu1  ;;  %v3173_v47 = vld [vmem:[%s4531_s4 + $0x8] ss:$16 sps:$4 sm:$0xff]   ;;  %v3184_v50 = vld [vmem:[%s4531_s4 + $0x3ec] ss:$16 sps:$4 sm:$0xff]  }
  0xd0   :  { %v215_v53 = vadd.f32 %v214_v52, %v61_v46  ;;  %v342_v55 = vmax.f32 %v213_v49, 0.0  ;;  %v344_v56 = vmax.f32 %v254_v51, 0.0  ;;  %v256_v57 = vadd.f32 %v255_v54, %v69_v48  ;;  %v3178_v46 = vld [vmem:[%s4531_s4 + $0x20c] ss:$16 sps:$4 sm:$0xff]   ;;  %v3176_v48 = vld [vmem:[%s4531_s4 + $0x208] ss:$16 sps:$4 sm:$0xff]  }
  0xd1   :  { %v216_v58 = vpop.f32.mrf.mxu0  ;;  %v257_v60 = vpop.f32.mrf.mxu1  ;;  %v3181_v49 = vld [vmem:[%s4531_s4 + $0x1ec] ss:$16 sps:$4 sm:$0xff]   ;;  %v3179_v51 = vld [vmem:[%s4531_s4 + $0x1e8] ss:$16 sps:$4 sm:$0xff]  }
  0xd2   :  { %v343_v59 = vmax.f32 %v215_v53, 0.0  ;;  %v345_v61 = vmax.f32 %v256_v57, 0.0  ;;  %v3774_v63 = vpack.c.bf16 %v344_v56, %v344_v56  ;;  %v3779_v3 = vpack.c.bf16 %v342_v55, %v342_v55  ;;  %v3182_v52 = vld [vmem:[%s4531_s4 + $0x3e8] ss:$16 sps:$4 sm:$0xff]   ;;  %v3187_v53 = vld [vmem:[%s4531_s4 + $0x1cc] ss:$16 sps:$4 sm:$0xff]  }
  0xd3   :  { %v217_v62 = vpop.f32.mrf.mxu0  ;;  %v258_v1 = vpop.f32.mrf.mxu1  ;;  %v3190_v54 = vld [vmem:[%s4531_s4 + $0x3cc] ss:$16 sps:$4 sm:$0xff]   ;;  %v3185_v55 = vld [vmem:[%s4531_s4 + $0x1c8] ss:$16 sps:$4 sm:$0xff]  }
  0xd4   :  { %v351_v0 = vpack.c.bf16 %v343_v59, %v343_v59  ;;  %v353_v4 = vpack.c.bf16 %v345_v61, %v345_v61  ;;  %v3188_v56 = vld [vmem:[%s4531_s4 + $0x3c8] ss:$16 sps:$4 sm:$0xff]   ;;  %v3193_v57 = vld [vmem:[%s4531_s4 + $0x1ac] ss:$16 sps:$4 sm:$0xff]  }
  0xd5   :  { %v3784_v6 = vpop.f32.mrf.mxu0  ;;  %v3789_v8 = vpop.f32.mrf.mxu1  ;;  %v3196_v58 = vld [vmem:[%s4531_s4 + $0x3ac] ss:$16 sps:$4 sm:$0xff]   ;;  %v3191_v59 = vld [vmem:[%s4531_s4 + $0x1a8] ss:$16 sps:$4 sm:$0xff]  }
  0xd6   :  { %1175 = vmatprep.mubr.bf16.mxu0 %v351_v0  ;;  %1216 = vmatprep.mubr.bf16.mxu1 %v353_v4  ;;  %v3194_v60 = vld [vmem:[%s4531_s4 + $0x3a8] ss:$16 sps:$4 sm:$0xff]   ;;  %v3199_v61 = vld [vmem:[%s4531_s4 + $0x18c] ss:$16 sps:$4 sm:$0xff]  }
  0xd7   :  { %1176 = vmatmul.mubr.bf16.vlgmr.msra.gmra.mxu0 %v3779_v3  ;;  %v3795_v10 = vpop.f32.mrf.mxu0  ;;  %1217 = vmatmul.mubr.bf16.vlgmr.msra.gmra.mxu1 %v3774_v63  ;;  %v3801_v12 = vpop.f32.mrf.mxu1  ;;  %v3202_v62 = vld [vmem:[%s4531_s4 + $0x38c] ss:$16 sps:$4 sm:$0xff]   ;;  %v3200_v1 = vld [vmem:[%s4531_s4 + $0x388] ss:$16 sps:$4 sm:$0xff]  }
  0xd8   :  { %1226 = vmatpush1.bf16.msra.mxu0 %v3131_v2  ;;  %1267 = vmatpush1.bf16.msra.mxu1 %v3134_v5  ;;  %v3205_v2 = vld [vmem:[%s4531_s4 + $0x16c] ss:$16 sps:$4 sm:$0xff]   ;;  %v3203_v5 = vld [vmem:[%s4531_s4 + $0x168] ss:$16 sps:$4 sm:$0xff]  }
  0xd9   :  { %1257 = vmatprep.mubr.bf16.mxu0 %v351_v0  ;;  %v298_v15 = vpop.f32.mrf.mxu0  ;;  %1298 = vmatprep.mubr.bf16.mxu1 %v353_v4  ;;  %v339_v17 = vpop.f32.mrf.mxu1  ;;  %v3197_v0 = vld [vmem:[%s4531_s4 + $0x188] ss:$16 sps:$4 sm:$0xff]   ;;  %v3208_v4 = vld [vmem:[%s4531_s4 + $0x36c] ss:$16 sps:$4 sm:$0xff]  }
  0xda   :  { %1227 = vmatprep.subr.bf16.mxu0 %v3139_v7  ;;  %1268 = vmatprep.subr.bf16.mxu1 %v3142_v9  ;;  %v3206_v7 = vld [vmem:[%s4531_s4 + $0x368] ss:$16 sps:$4 sm:$0xff]   ;;  %v3211_v9 = vld [vmem:[%s4531_s4 + $0x14c] ss:$16 sps:$4 sm:$0xff]  }
  0xdb   :  { %v299_v18 = vpop.f32.mrf.mxu0  ;;  %v340_v20 = vpop.f32.mrf.mxu1  ;;  %v3217_v15 = vld [vmem:[%s4531_s4 + $0x12c] ss:$16 sps:$4 sm:$0xff]   ;;  %v3215_v17 = vld [vmem:[%s4531_s4 + $0x128] ss:$16 sps:$4 sm:$0xff]  }
  0xdc   :  { %1228 = vmatpush1.bf16.msra.mxu0 %v3137_v11  ;;  %1269 = vmatpush1.bf16.msra.mxu1 %v3140_v13  ;;  %v3214_v11 = vld [vmem:[%s4531_s4 + $0x34c] ss:$16 sps:$4 sm:$0xff]   ;;  %v3209_v13 = vld [vmem:[%s4531_s4 + $0x148] ss:$16 sps:$4 sm:$0xff]  }
  0xdd   :  { %1229 = vmatprep.subr.bf16.mxu0 %v3145_v14  ;;  %1270 = vmatprep.subr.bf16.mxu1 %v3148_v16  ;;  %v3212_v14 = vld [vmem:[%s4531_s4 + $0x348] ss:$16 sps:$4 sm:$0xff]   ;;  %v3220_v16 = vld [vmem:[%s4531_s4 + $0x32c] ss:$16 sps:$4 sm:$0xff]  }
  0xde   :  { %v3218_v18 = vld [vmem:[%s4531_s4 + $0x328] ss:$16 sps:$4 sm:$0xff]   ;;  %v3226_v20 = vld [vmem:[%s4531_s4 + $0x30c] ss:$16 sps:$4 sm:$0xff]  }
  0xe0   :  { %1230 = vmatpush1.bf16.msra.mxu0 %v3143_v19  ;;  %1271 = vmatpush1.bf16.msra.mxu1 %v3146_v21  ;;  %v3223_v19 = vld [vmem:[%s4531_s4 + $0x10c] ss:$16 sps:$4 sm:$0xff]   ;;  %v3221_v21 = vld [vmem:[%s4531_s4 + $0x108] ss:$16 sps:$4 sm:$0xff]  }
  0xe1   :  { %1231 = vmatprep.subr.bf16.mxu0 %v3151_v22  ;;  %1272 = vmatprep.subr.bf16.mxu1 %v3154_v23  ;;  %v3224_v22 = vld [vmem:[%s4531_s4 + $0x308] ss:$16 sps:$4 sm:$0xff]  }
  0xe2   :  { %v3227_v23 = vld [vmem:[%s4532_s6 + $0x78] sm:$0xff]  }
  0xe4   :  { %1232 = vmatpush1.bf16.msra.mxu0 %v3149_v24  ;;  %1273 = vmatpush1.bf16.msra.mxu1 %v3152_v25  ;;  %v3228_v24 = vld [vmem:[%s4532_s6 + $0x38] sm:$0xff]   ;;  %v3229_v25 = vld [vmem:[%s4532_s6 + $0x70] sm:$0xff]  }
  0xe5   :  { %1233 = vmatprep.subr.bf16.mxu0 %v3157_v26  ;;  %1274 = vmatprep.subr.bf16.mxu1 %v3160_v27  ;;  %v3230_v26 = vld [vmem:[%s4532_s6 + $0x30] sm:$0xff]   ;;  %v3231_v27 = vld [vmem:[%s4532_s6 + $0x68] sm:$0xff]  }
  0xe8   :  { %1234 = vmatpush1.bf16.msra.mxu0 %v3155_v28  ;;  %1275 = vmatpush1.bf16.msra.mxu1 %v3158_v29  ;;  %v3232_v28 = vld [vmem:[%s4532_s6 + $0x28] sm:$0xff]   ;;  %v3235_v29 = vld [vmem:[%s4532_s6 + $0x58] sm:$0xff]  }
  0xe9   :  { %1235 = vmatprep.subr.bf16.mxu0 %v3163_v30  ;;  %1276 = vmatprep.subr.bf16.mxu1 %v3166_v31  ;;  %v3236_v30 = vld [vmem:[%s4532_s6 + $0x18] sm:$0xff]   ;;  %v3237_v31 = vld [vmem:[%s4532_s6 + $0x50] sm:$0xff]  }
  0xec   :  { %1236 = vmatpush1.bf16.msra.mxu0 %v3161_v32  ;;  %1277 = vmatpush1.bf16.msra.mxu1 %v3164_v33  ;;  %v3238_v32 = vld [vmem:[%s4532_s6 + $0x10] sm:$0xff]   ;;  %v3239_v33 = vld [vmem:[%s4532_s6 + $0x48] sm:$0xff]  }
  0xed   :  { %1237 = vmatprep.subr.bf16.mxu0 %v3169_v34  ;;  %1278 = vmatprep.subr.bf16.mxu1 %v3172_v35  ;;  %v3240_v34 = vld [vmem:[%s4532_s6 + $0x8] sm:$0xff]   ;;  %v3241_v35 = vld [vmem:[%s4532_s6 + $0x40] sm:$0xff]  }
  0xf0   :  { %1238 = vmatpush1.bf16.msra.mxu0 %v3167_v36  ;;  %1279 = vmatpush1.bf16.msra.mxu1 %v3170_v44  ;;  %v3242_v36 = vld [vmem:[%s4532_s6] sm:$0xff]  }
  0xf1   :  { %1239 = vmatprep.subr.bf16.mxu0 %v3175_v45  ;;  %1280 = vmatprep.subr.bf16.mxu1 %v3178_v46  ;;  %v3245_v44 = vld [vmem:[%s4534_s5 + $0xe4] ss:$16 sps:$4 sm:$0xff]   ;;  %v3267_v45 = vld [vmem:[%s4532_s6 + $0xf8] sm:$0xff]  }
  0xf2   :  { %v3268_v46 = vld [vmem:[%s4532_s6 + $0xb8] sm:$0xff]  }
  0xf4   :  { %1240 = vmatpush1.bf16.msra.mxu0 %v3173_v47  ;;  %1281 = vmatpush1.bf16.msra.mxu1 %v3176_v48  ;;  %v3272_v47 = vld [vmem:[%s4532_s6 + $0xf0] sm:$0xff]  }
  0xf5   :  { %1241 = vmatprep.subr.bf16.mxu0 %v3181_v49  ;;  %1282 = vmatprep.subr.bf16.mxu1 %v3184_v50  ;;  %v3273_v48 = vld [vmem:[%s4532_s6 + $0xb0] sm:$0xff]   ;;  %v3277_v49 = vld [vmem:[%s4532_s6 + $0xe8] sm:$0xff]  }
  0xf6   :  { %v3278_v50 = vld [vmem:[%s4532_s6 + $0xa8] sm:$0xff]  }
  0xf8   :  { %1242 = vmatpush2.bf16.msra.mxu0 %v3179_v51  ;;  %1283 = vmatpush2.bf16.msra.mxu1 %v3182_v52  ;;  %v3282_v51 = vld [vmem:[%s4532_s6 + $0xe0] sm:$0xff]  }
  0xf9   :  { %1243 = vmatprep.subr.bf16.mxu0 %v3187_v53  ;;  %1284 = vmatprep.subr.bf16.mxu1 %v3190_v54  ;;  %v3283_v52 = vld [vmem:[%s4532_s6 + $0xa0] sm:$0xff]   ;;  %v3287_v53 = vld [vmem:[%s4532_s6 + $0xd8] sm:$0xff]  }
  0xfa   :  { %v3288_v54 = vld [vmem:[%s4532_s6 + $0x98] sm:$0xff]  }
  0xfc   :  { %1244 = vmatpush2.bf16.msra.mxu0 %v3185_v55  ;;  %1285 = vmatpush2.bf16.msra.mxu1 %v3188_v56  ;;  %v3292_v55 = vld [vmem:[%s4532_s6 + $0xd0] sm:$0xff]  }
  0xfd   :  { %1245 = vmatprep.subr.bf16.mxu0 %v3193_v57  ;;  %1286 = vmatprep.subr.bf16.mxu1 %v3196_v58  ;;  %v3293_v56 = vld [vmem:[%s4532_s6 + $0x90] sm:$0xff]   ;;  %v3297_v57 = vld [vmem:[%s4532_s6 + $0xc8] sm:$0xff]  }
  0xfe   :  { %v3298_v58 = vld [vmem:[%s4532_s6 + $0x88] sm:$0xff]  }
 0x100   :  { %1246 = vmatpush2.bf16.msra.mxu0 %v3191_v59  ;;  %1287 = vmatpush2.bf16.msra.mxu1 %v3194_v60  ;;  %v3302_v59 = vld [vmem:[%s4532_s6 + $0xc0] sm:$0xff]  }
 0x101   :  { %1247 = vmatprep.subr.bf16.mxu0 %v3199_v61  ;;  %1288 = vmatprep.subr.bf16.mxu1 %v3202_v62  ;;  %v3303_v60 = vld [vmem:[%s4532_s6 + $0x80] sm:$0xff]   ;;  %v4081_v62 = vld [vmem:[%s4533_s2 + $0x8] sm:$0xf] }
 0x102   :  { %v3309_v61 = vld [vmem:[%s4534_s5 + $0x2e4] ss:$16 sps:$4 sm:$0xff]  }
 0x104   :  { %1248 = vmatpush2.bf16.msra.mxu0 %v3197_v0  ;;  %1289 = vmatpush2.bf16.msra.mxu1 %v3200_v1  ;;  %v76_v0 = vsub.s32 5, %v3747_v38  ;;  %v486_v1 = vrot.slane %v4081_v62, %v3750_v39 }
 0x105   :  { %1249 = vmatprep.subr.bf16.mxu0 %v3205_v2  ;;  %1290 = vmatprep.subr.bf16.mxu1 %v3208_v4  ;;  %v490_v4 = vrot.slane %v4081_v62, %v3761_v42 }
 0x106   :  { %v77_v2 = vrot.slane %v3755_v40, %v76_v0 }
 0x108   :  { %1250 = vmatpush2.bf16.msra.mxu0 %v3203_v5  ;;  %1291 = vmatpush2.bf16.msra.mxu1 %v3206_v7 }
 0x109   :  { %1251 = vmatprep.subr.bf16.mxu0 %v3211_v9  ;;  %1292 = vmatprep.subr.bf16.mxu1 %v3214_v11 }
 0x10c   :  { %1252 = vmatpush2.bf16.msra.mxu0 %v3209_v13  ;;  %1293 = vmatpush2.bf16.msra.mxu1 %v3212_v14  ;;  %v297_v13 = vadd.f32 %v3795_v10, %v77_v2  ;;  %v3248_v10 = vld [vmem:[%s4534_s5 + $0xc4] ss:$16 sps:$4 sm:$0xff]  }
 0x10d   :  { %1253 = vmatprep.subr.bf16.mxu0 %v3217_v15  ;;  %1294 = vmatprep.subr.bf16.mxu1 %v3220_v16 }
 0x110   :  { %1254 = vmatpush2.bf16.msra.mxu0 %v3215_v17  ;;  %1295 = vmatpush2.bf16.msra.mxu1 %v3218_v18 }
 0x111   :  { %1255 = vmatprep.subr.bf16.mxu0 %v3223_v19  ;;  %1296 = vmatprep.subr.bf16.mxu1 %v3226_v20 }
 0x114   :  { %1256 = vmatpush2.bf16.msra.mxu0 %v3221_v21  ;;  %1297 = vmatpush2.bf16.msra.mxu1 %v3224_v22  ;;  %v347_v22 = vmax.f32 %v297_v13, 0.0 }
 0x115   :  { %2990 = vmatprep.subr.bf16.mxu0 %v3227_v23  ;;  %3012 = vmatprep.subr.bf16.mxu1 %v3267_v45  ;;  %v3266_v45 = vld [vmem:[%s4534_s5 + $0x4] ss:$16 sps:$4 sm:$0xff]  }
 0x117   :  { %1258 = vmatmul.mubr.bf16.vlgmr.msra.gmra.mxu0 %v3779_v3  ;;  %1299 = vmatmul.mubr.bf16.vlgmr.msra.gmra.mxu1 %v3774_v63  ;;  %v3233_v63 = vld [vmem:[%s4532_s6 + $0x60] sm:$0xff]  }
 0x118   :  { %2991 = vmatpush3.bf16.msra.mxu0 %v3228_v24  ;;  %v3234_v3 = vld [vmem:[%s4532_s6 + $0x20] sm:$0xff]   ;;  %3013 = vmatpush3.bf16.msra.mxu1 %v3268_v46 }
 0x119   :  { %2992 = vmatprep.subr.bf16.mxu0 %v3229_v25  ;;  %3014 = vmatprep.subr.bf16.mxu1 %v3272_v47  ;;  %v3264_v46 = vld [vmem:[%s4534_s5] ss:$16 sps:$4 sm:$0xff]   ;;  %v3271_v47 = vld [vmem:[%s4534_s5 + $0x1e4] ss:$16 sps:$4 sm:$0xff]  }
 0x11c   :  { %2993 = vmatpush3.bf16.msra.mxu0 %v3230_v26  ;;  %3015 = vmatpush3.bf16.msra.mxu1 %v3273_v48  ;;  %v3243_v26 = vld [vmem:[%s4534_s5 + $0xe0] ss:$16 sps:$4 sm:$0xff]  }
 0x11d   :  { %2994 = vmatprep.subr.bf16.mxu0 %v3231_v27  ;;  %3016 = vmatprep.subr.bf16.mxu1 %v3277_v49  ;;  %v3269_v48 = vld [vmem:[%s4534_s5 + $0x1e0] ss:$16 sps:$4 sm:$0xff]   ;;  %v3276_v49 = vld [vmem:[%s4534_s5 + $0x1c4] ss:$16 sps:$4 sm:$0xff]  }
 0x120   :  { %2995 = vmatpush3.bf16.msra.mxu0 %v3232_v28  ;;  %3017 = vmatpush3.bf16.msra.mxu1 %v3278_v50  ;;  %v4096_v28 = vpack.c.bf16 %v347_v22, %v347_v22  ;;  %v3274_v50 = vld [vmem:[%s4534_s5 + $0x1c0] ss:$16 sps:$4 sm:$0xff]  }
 0x121   :  { %2996 = vmatprep.subr.bf16.mxu0 %v3233_v63  ;;  %3018 = vmatprep.subr.bf16.mxu1 %v3282_v51  ;;  %v3246_v63 = vld [vmem:[%s4534_s5 + $0xc0] ss:$16 sps:$4 sm:$0xff]   ;;  %v3281_v51 = vld [vmem:[%s4534_s5 + $0x1a4] ss:$16 sps:$4 sm:$0xff]  }
 0x124   :  { %2997 = vmatpush3.bf16.msra.mxu0 %v3234_v3  ;;  %3019 = vmatpush3.bf16.msra.mxu1 %v3283_v52  ;;  %v3251_v3 = vld [vmem:[%s4534_s5 + $0xa4] ss:$16 sps:$4 sm:$0xff]   ;;  %v3279_v52 = vld [vmem:[%s4534_s5 + $0x1a0] ss:$16 sps:$4 sm:$0xff]  }
 0x125   :  { %2998 = vmatprep.subr.bf16.mxu0 %v3235_v29  ;;  %3020 = vmatprep.subr.bf16.mxu1 %v3287_v53  ;;  %v3249_v29 = vld [vmem:[%s4534_s5 + $0xa0] ss:$16 sps:$4 sm:$0xff]   ;;  %v3286_v53 = vld [vmem:[%s4534_s5 + $0x184] ss:$16 sps:$4 sm:$0xff]  }
 0x128   :  { %2999 = vmatpush3.bf16.msra.mxu0 %v3236_v30  ;;  %3021 = vmatpush3.bf16.msra.mxu1 %v3288_v54  ;;  %v3254_v30 = vld [vmem:[%s4534_s5 + $0x84] ss:$16 sps:$4 sm:$0xff]   ;;  %v3284_v54 = vld [vmem:[%s4534_s5 + $0x180] ss:$16 sps:$4 sm:$0xff]  }
 0x129   :  { %3000 = vmatprep.subr.bf16.mxu0 %v3237_v31  ;;  %3022 = vmatprep.subr.bf16.mxu1 %v3292_v55  ;;  %v3252_v31 = vld [vmem:[%s4534_s5 + $0x80] ss:$16 sps:$4 sm:$0xff]   ;;  %v3291_v55 = vld [vmem:[%s4534_s5 + $0x164] ss:$16 sps:$4 sm:$0xff]  }
 0x12c   :  { %3001 = vmatpush3.bf16.msra.mxu0 %v3238_v32  ;;  %3023 = vmatpush3.bf16.msra.mxu1 %v3293_v56  ;;  %v3257_v32 = vld [vmem:[%s4534_s5 + $0x64] ss:$16 sps:$4 sm:$0xff]   ;;  %v3289_v56 = vld [vmem:[%s4534_s5 + $0x160] ss:$16 sps:$4 sm:$0xff]  }
 0x12d   :  { %3002 = vmatprep.subr.bf16.mxu0 %v3239_v33  ;;  %3024 = vmatprep.subr.bf16.mxu1 %v3297_v57  ;;  %v3255_v33 = vld [vmem:[%s4534_s5 + $0x60] ss:$16 sps:$4 sm:$0xff]   ;;  %v72_v57 = vsub.s32 4, %v3747_v38 }
 0x12f   :  { %v73_v0 = vrot.slane %v3755_v40, %v72_v57  ;;  %v3345_v57 = vld [vmem:[%s4534_s5 + $0x224] ss:$16 sps:$4 sm:$0xff]  }
 0x130   :  { %3003 = vmatpush3.bf16.msra.mxu0 %v3240_v34  ;;  %3025 = vmatpush3.bf16.msra.mxu1 %v3298_v58  ;;  %v3260_v34 = vld [vmem:[%s4534_s5 + $0x44] ss:$16 sps:$4 sm:$0xff]  }
 0x131   :  { %3004 = vmatprep.subr.bf16.mxu0 %v3241_v35  ;;  %3026 = vmatprep.subr.bf16.mxu1 %v3302_v59  ;;  %v3258_v35 = vld [vmem:[%s4534_s5 + $0x40] ss:$16 sps:$4 sm:$0xff]   ;;  %v3296_v58 = vld [vmem:[%s4534_s5 + $0x144] ss:$16 sps:$4 sm:$0xff]   ;;  %v84_v59 = vsub.s32 7, %v3747_v38  ;;  %v295_v13 = vadd.f32 %v3784_v6, %v73_v0 }
 0x132   :  { %v3354_v0 = vld [vmem:[%s4534_s5 + $0xc] ss:$16 sps:$4 sm:$0xff]  }
 0x133   :  { %v85_v2 = vrot.slane %v3755_v40, %v84_v59  ;;  %v346_v6 = vmax.f32 %v295_v13, 0.0  ;;  %v3343_v59 = vld [vmem:[%s4534_s5 + $0x220] ss:$16 sps:$4 sm:$0xff]   ;;  %v3366_v13 = vld [vmem:[%s4534_s5 + $0x1cc] ss:$16 sps:$4 sm:$0xff]  }
 0x134   :  { %3005 = vmatpush3.bf16.msra.mxu0 %v3242_v36  ;;  %3027 = vmatpush3.bf16.msra.mxu1 %v3303_v60  ;;  %v3263_v36 = vld [vmem:[%s4534_s5 + $0x24] ss:$16 sps:$4 sm:$0xff]   ;;  %v494_v60 = vrot.slane %v4081_v62, %v3758_v41 }
 0x135   :  { %2450 = vmatprep.subr.bf16.mxu0 %v3245_v44  ;;  %2491 = vmatprep.subr.bf16.mxu1 %v3309_v61  ;;  %v3261_v44 = vld [vmem:[%s4534_s5 + $0x20] ss:$16 sps:$4 sm:$0xff]   ;;  %v338_v40 = vadd.f32 %v3801_v12, %v85_v2  ;;  %v3352_v2 = vld [vmem:[%s4534_s5 + $0x8] ss:$16 sps:$4 sm:$0xff]  }
 0x136   :  { %v3294_v61 = vld [vmem:[%s4534_s5 + $0x140] ss:$16 sps:$4 sm:$0xff]  }
 0x137   :  { %v349_v12 = vmax.f32 %v338_v40, 0.0  ;;  %v3369_v40 = vld [vmem:[%s4534_s5 + $0x3a4] ss:$16 sps:$4 sm:$0xff]  }
 0x197   :  { %v1177_v5 = vpop.f32.mrf.mxu0  ;;  %v1218_v9 = vpop.f32.mrf.mxu1 }
 0x198   :  { %v1178_v7 = vadd.f32 %v1177_v5, %v486_v1  ;;  %v3301_v1 = vld [vmem:[%s4534_s5 + $0x124] ss:$16 sps:$4 sm:$0xff]  }
 0x199   :  { %v1179_v11 = vpop.f32.mrf.mxu0  ;;  %v1220_v16 = vpop.f32.mrf.mxu1 }
 0x19a   :  { %v1219_v14 = vadd.f32 %v1218_v9, %v1178_v7  ;;  %v1180_v15 = vadd.f32 %v1179_v11, %v490_v4  ;;  %v498_v4 = vrot.slane %v4081_v62, %v3764_v43  ;;  %v3299_v11 = vld [vmem:[%s4534_s5 + $0x120] ss:$16 sps:$4 sm:$0xff]  }
 0x19b   :  { %v1181_v17 = vpop.f32.mrf.mxu0  ;;  %v1222_v19 = vpop.f32.mrf.mxu1 }
 0x19c   :  { %v1221_v18 = vadd.f32 %v1220_v16, %v1180_v15  ;;  %v1307_v20 = vmax.f32 %v1219_v14, 0.0  ;;  %v3306_v15 = vld [vmem:[%s4534_s5 + $0x104] ss:$16 sps:$4 sm:$0xff]  }
 0x19d   :  { %v1182_v21 = vpop.f32.mrf.mxu0  ;;  %v1223_v24 = vpop.f32.mrf.mxu1 }
 0x19e   :  { %v1308_v23 = vmax.f32 %v1221_v18, 0.0  ;;  %v1311_v27 = vpack.c.bf16 %v1307_v20, %v1307_v20  ;;  %v3304_v21 = vld [vmem:[%s4534_s5 + $0x100] ss:$16 sps:$4 sm:$0xff]   ;;  %v3312_v24 = vld [vmem:[%s4534_s5 + $0xec] ss:$16 sps:$4 sm:$0xff]  }
 0x1a0   :  { %v1312_v25 = vpack.c.bf16 %v1308_v23, %v1308_v23 }
 0x1a2   :  { %1609 = vmatprep.mubr.bf16.mxu0 %v1312_v25 }
 0x1a3   :  { %1610 = vmatmul.mubr.bf16.vlgmr.msra.gmra.mxu0 %v1311_v27 }
 0x1a4   :  { %2451 = vmatpush1.bf16.msra.mxu0 %v3243_v26  ;;  %2482 = vmatprep.mubr.bf16.mxu0 %v4096_v28 }
 0x1a5   :  { %2452 = vmatprep.subr.bf16.mxu0 %v3248_v10  ;;  %v3307_v10 = vld [vmem:[%s4534_s5 + $0x2e0] ss:$16 sps:$4 sm:$0xff]  }
 0x1a8   :  { %2453 = vmatpush1.bf16.msra.mxu0 %v3246_v63  ;;  %v4202_v63 = vpack.c.bf16 %v346_v6, %v346_v6  ;;  %v3381_v6 = vld [vmem:[%s4534_s5 + $0x364] ss:$16 sps:$4 sm:$0xff]  }
 0x1a9   :  { %2454 = vmatprep.subr.bf16.mxu0 %v3251_v3 }
 0x1ac   :  { %2455 = vmatpush1.bf16.msra.mxu0 %v3249_v29  ;;  %v3310_v29 = vld [vmem:[%s4534_s5 + $0xe8] ss:$16 sps:$4 sm:$0xff]  }
 0x1ad   :  { %2456 = vmatprep.subr.bf16.mxu0 %v3254_v30  ;;  %v4207_v30 = vpack.c.bf16 %v349_v12, %v349_v12  ;;  %v3382_v12 = vld [vmem:[%s4534_s5 + $0x168] ss:$16 sps:$4 sm:$0xff]  }
 0x1b0   :  { %2457 = vmatpush1.bf16.msra.mxu0 %v3252_v31  ;;  %v3315_v31 = vld [vmem:[%s4534_s5 + $0x2c4] ss:$16 sps:$4 sm:$0xff]  }
 0x1b1   :  { %2458 = vmatprep.subr.bf16.mxu0 %v3257_v32  ;;  %v3318_v32 = vld [vmem:[%s4534_s5 + $0xcc] ss:$16 sps:$4 sm:$0xff]  }
 0x1b4   :  { %2459 = vmatpush1.bf16.msra.mxu0 %v3255_v33  ;;  %v3313_v33 = vld [vmem:[%s4534_s5 + $0x2c0] ss:$16 sps:$4 sm:$0xff]  }
 0x1b5   :  { %2460 = vmatprep.subr.bf16.mxu0 %v3260_v34  ;;  %v3316_v34 = vld [vmem:[%s4534_s5 + $0xc8] ss:$16 sps:$4 sm:$0xff]  }
 0x1b8   :  { %2461 = vmatpush1.bf16.msra.mxu0 %v3258_v35  ;;  %v3321_v35 = vld [vmem:[%s4534_s5 + $0x2a4] ss:$16 sps:$4 sm:$0xff]  }
 0x1b9   :  { %2462 = vmatprep.subr.bf16.mxu0 %v3263_v36  ;;  %v3324_v36 = vld [vmem:[%s4534_s5 + $0xac] ss:$16 sps:$4 sm:$0xff]  }
 0x1bc   :  { %2463 = vmatpush1.bf16.msra.mxu0 %v3261_v44  ;;  %v3319_v44 = vld [vmem:[%s4534_s5 + $0x2a0] ss:$16 sps:$4 sm:$0xff]  }
 0x1bd   :  { %2464 = vmatprep.subr.bf16.mxu0 %v3266_v45  ;;  %v3327_v45 = vld [vmem:[%s4534_s5 + $0x284] ss:$16 sps:$4 sm:$0xff]  }
 0x1c0   :  { %2465 = vmatpush1.bf16.msra.mxu0 %v3264_v46  ;;  %v3330_v46 = vld [vmem:[%s4534_s5 + $0x8c] ss:$16 sps:$4 sm:$0xff]  }
 0x1c1   :  { %2466 = vmatprep.subr.bf16.mxu0 %v3271_v47  ;;  %v3325_v47 = vld [vmem:[%s4534_s5 + $0x280] ss:$16 sps:$4 sm:$0xff]  }
 0x1c4   :  { %2467 = vmatpush2.bf16.msra.mxu0 %v3269_v48  ;;  %v3328_v48 = vld [vmem:[%s4534_s5 + $0x88] ss:$16 sps:$4 sm:$0xff]  }
 0x1c5   :  { %2468 = vmatprep.subr.bf16.mxu0 %v3276_v49  ;;  %v3333_v49 = vld [vmem:[%s4534_s5 + $0x264] ss:$16 sps:$4 sm:$0xff]  }
 0x1c8   :  { %2469 = vmatpush2.bf16.msra.mxu0 %v3274_v50  ;;  %v3336_v50 = vld [vmem:[%s4534_s5 + $0x6c] ss:$16 sps:$4 sm:$0xff]  }
 0x1c9   :  { %2470 = vmatprep.subr.bf16.mxu0 %v3281_v51  ;;  %v3331_v51 = vld [vmem:[%s4534_s5 + $0x260] ss:$16 sps:$4 sm:$0xff]  }
 0x1cc   :  { %2471 = vmatpush2.bf16.msra.mxu0 %v3279_v52  ;;  %v3334_v52 = vld [vmem:[%s4534_s5 + $0x68] ss:$16 sps:$4 sm:$0xff]  }
 0x1cd   :  { %2472 = vmatprep.subr.bf16.mxu0 %v3286_v53  ;;  %v3339_v53 = vld [vmem:[%s4534_s5 + $0x244] ss:$16 sps:$4 sm:$0xff]  }
 0x1d0   :  { %2473 = vmatpush2.bf16.msra.mxu0 %v3284_v54  ;;  %v3342_v54 = vld [vmem:[%s4534_s5 + $0x4c] ss:$16 sps:$4 sm:$0xff]  }
 0x1d1   :  { %2474 = vmatprep.subr.bf16.mxu0 %v3291_v55  ;;  %v3337_v55 = vld [vmem:[%s4534_s5 + $0x240] ss:$16 sps:$4 sm:$0xff]  }
 0x1d4   :  { %2475 = vmatpush2.bf16.msra.mxu0 %v3289_v56  ;;  %v3340_v56 = vld [vmem:[%s4534_s5 + $0x48] ss:$16 sps:$4 sm:$0xff]  }
 0x1d5   :  { %2476 = vmatprep.subr.bf16.mxu0 %v3296_v58  ;;  %v3348_v58 = vld [vmem:[%s4534_s5 + $0x2c] ss:$16 sps:$4 sm:$0xff]  }
 0x1d7   :  { %v1259_v5 = vpop.f32.mrf.mxu0  ;;  %v1300_v9 = vpop.f32.mrf.mxu1 }
 0x1d8   :  { %v1260_v7 = vadd.f32 %v1259_v5, %v494_v60  ;;  %2477 = vmatpush2.bf16.msra.mxu0 %v3294_v61  ;;  %v3346_v60 = vld [vmem:[%s4534_s5 + $0x28] ss:$16 sps:$4 sm:$0xff]   ;;  %v3351_v61 = vld [vmem:[%s4534_s5 + $0x204] ss:$16 sps:$4 sm:$0xff]   ;;  %v3360_v5 = vld [vmem:[%s4534_s5 + $0x1ec] ss:$16 sps:$4 sm:$0xff]  }
 0x1d9   :  { %v1261_v14 = vpop.f32.mrf.mxu0  ;;  %2478 = vmatprep.subr.bf16.mxu0 %v3301_v1  ;;  %v1302_v17 = vpop.f32.mrf.mxu1  ;;  %v3349_v1 = vld [vmem:[%s4534_s5 + $0x200] ss:$16 sps:$4 sm:$0xff]  }
 0x1da   :  { %v1301_v16 = vadd.f32 %v1300_v9, %v1260_v7  ;;  %v1262_v62 = vadd.f32 %v1261_v14, %v498_v4  ;;  %v3357_v4 = vld [vmem:[%s4534_s5 + $0x3e4] ss:$16 sps:$4 sm:$0xff]   ;;  %v3355_v7 = vld [vmem:[%s4534_s5 + $0x3e0] ss:$16 sps:$4 sm:$0xff]   ;;  %v3358_v9 = vld [vmem:[%s4534_s5 + $0x1e8] ss:$16 sps:$4 sm:$0xff]  }
 0x1db   :  { %v1263_v18 = vpop.f32.mrf.mxu0  ;;  %v1304_v20 = vpop.f32.mrf.mxu1  ;;  %v3361_v14 = vld [vmem:[%s4534_s5 + $0x3c0] ss:$16 sps:$4 sm:$0xff]  }
 0x1dc   :  { %v1303_v19 = vadd.f32 %v1302_v17, %v1262_v62  ;;  %2479 = vmatpush2.bf16.msra.mxu0 %v3299_v11  ;;  %v1309_v22 = vmax.f32 %v1301_v16, 0.0  ;;  %v3363_v11 = vld [vmem:[%s4534_s5 + $0x3c4] ss:$16 sps:$4 sm:$0xff]   ;;  %v3372_v16 = vld [vmem:[%s4534_s5 + $0x1ac] ss:$16 sps:$4 sm:$0xff]  }
 0x1dd   :  { %v1264_v23 = vpop.f32.mrf.mxu0  ;;  %2480 = vmatprep.subr.bf16.mxu0 %v3306_v15  ;;  %v1305_v26 = vpop.f32.mrf.mxu1  ;;  %v3364_v15 = vld [vmem:[%s4534_s5 + $0x1c8] ss:$16 sps:$4 sm:$0xff]   ;;  %v3367_v62 = vld [vmem:[%s4534_s5 + $0x3a0] ss:$16 sps:$4 sm:$0xff]   ;;  %v3375_v18 = vld [vmem:[%s4534_s5 + $0x384] ss:$16 sps:$4 sm:$0xff]  }
 0x1de   :  { %v1310_v25 = vmax.f32 %v1303_v19, 0.0  ;;  %v1313_v3 = vpack.c.bf16 %v1309_v22, %v1309_v22  ;;  %v3370_v17 = vld [vmem:[%s4534_s5 + $0x1a8] ss:$16 sps:$4 sm:$0xff]   ;;  %v3378_v19 = vld [vmem:[%s4534_s5 + $0x18c] ss:$16 sps:$4 sm:$0xff]  }
 0x1df   :  { %v3373_v20 = vld [vmem:[%s4534_s5 + $0x380] ss:$16 sps:$4 sm:$0xff]   ;;  %v3384_v22 = vld [vmem:[%s4534_s5 + $0x16c] ss:$16 sps:$4 sm:$0xff]  }
 0x1e0   :  { %v1314_v27 = vpack.c.bf16 %v1310_v25, %v1310_v25  ;;  %2481 = vmatpush2.bf16.msra.mxu0 %v3304_v21  ;;  %v3376_v21 = vld [vmem:[%s4534_s5 + $0x188] ss:$16 sps:$4 sm:$0xff]   ;;  %v3379_v23 = vld [vmem:[%s4534_s5 + $0x360] ss:$16 sps:$4 sm:$0xff]   ;;  %v3387_v25 = vld [vmem:[%s4534_s5 + $0x344] ss:$16 sps:$4 sm:$0xff]  }
 0x1e1   :  { %2532 = vmatprep.subr.bf16.mxu0 %v3312_v24  ;;  %v80_v24 = vsub.s32 6, %v3747_v38  ;;  %v3390_v26 = vld [vmem:[%s4534_s5 + $0x14c] ss:$16 sps:$4 sm:$0xff]   ;;  %v3385_v38 = vld [vmem:[%s4534_s5 + $0x340] ss:$16 sps:$4 sm:$0xff]  }
 0x1e2   :  { %1649 = vmatprep.mubr.bf16.mxu1 %v1314_v27  ;;  %v3451_v27 = vld [vmem:[%s4533_s2] sm:$0xff] }
 0x1e3   :  { %1650 = vmatmul.mubr.bf16.vlgmr.msra.gmra.mxu1 %v1313_v3  ;;  %2483 = vmatmul.mubr.bf16.vlgmr.msra.gmra.mxu0 %v4202_v63  ;;  %v3388_v3 = vld [vmem:[%s4534_s5 + $0x148] ss:$16 sps:$4 sm:$0xff]  }
 0x1e4   :  { %2492 = vmatpush1.bf16.msra.mxu1 %v3307_v10  ;;  %2523 = vmatprep.mubr.bf16.mxu1 %v4207_v30  ;;  %v81_v10 = vrot.slane %v3451_v27, %v80_v24 }
 0x1e5   :  { %2533 = vmatpush1.bf16.msra.mxu0 %v3310_v29  ;;  %2564 = vmatprep.mubr.bf16.mxu0 %v4096_v28  ;;  %v3322_v28 = vld [vmem:[%s4534_s5 + $0xa8] ss:$16 sps:$4 sm:$0xff]   ;;  %v3393_v29 = vld [vmem:[%s4534_s5 + $0x324] ss:$16 sps:$4 sm:$0xff]  }
 0x1e6   :  { %2493 = vmatprep.subr.bf16.mxu1 %v3315_v31  ;;  %2534 = vmatprep.subr.bf16.mxu0 %v3318_v32  ;;  %v3396_v31 = vld [vmem:[%s4534_s5 + $0x12c] ss:$16 sps:$4 sm:$0xff]   ;;  %v3391_v32 = vld [vmem:[%s4534_s5 + $0x320] ss:$16 sps:$4 sm:$0xff]  }
 0x1e8   :  { %2494 = vmatpush1.bf16.msra.mxu1 %v3313_v33  ;;  %v336_v33 = vadd.f32 %v3789_v8, %v81_v10  ;;  %v3397_v8 = vld [vmem:[%s4534_s5 + $0x300] ss:$16 sps:$4 sm:$0xff]  }
 0x1e9   :  { %2535 = vmatpush1.bf16.msra.mxu0 %v3316_v34  ;;  %2495 = vmatprep.subr.bf16.mxu1 %v3321_v35  ;;  %v3394_v34 = vld [vmem:[%s4534_s5 + $0x128] ss:$16 sps:$4 sm:$0xff]   ;;  %v3399_v35 = vld [vmem:[%s4534_s5 + $0x304] ss:$16 sps:$4 sm:$0xff]  }
 0x1ea   :  { %2536 = vmatprep.subr.bf16.mxu0 %v3324_v36  ;;  %v3402_v36 = vld [vmem:[%s4534_s5 + $0x10c] ss:$16 sps:$4 sm:$0xff]   ;;  %v35_v10 = vld [vmem:[%s4535_s1] sm:$0xff] }
 0x1ec   :  { %2496 = vmatpush1.bf16.msra.mxu1 %v3319_v44  ;;  %v348_v44 = vmax.f32 %v336_v33, 0.0  ;;  %v2988_v33 = vld [vmem:[%s4533_s2 + $0x15] ss:$0 sm:$0xff] }
 0x1ed   :  { %2537 = vmatpush1.bf16.msra.mxu0 %v3322_v28  ;;  %2497 = vmatprep.subr.bf16.mxu1 %v3327_v45  ;;  %v3400_v28 = vld [vmem:[%s4534_s5 + $0x108] ss:$16 sps:$4 sm:$0xff]   ;;  %v3405_v45 = vld [vmem:[%s4534_s5 + $0x2ec] ss:$16 sps:$4 sm:$0xff]  }
 0x1ee   :  { %2538 = vmatprep.subr.bf16.mxu0 %v3330_v46  ;;  %v3403_v46 = vld [vmem:[%s4534_s5 + $0x2e8] ss:$16 sps:$4 sm:$0xff]  }
 0x1f0   :  { %2498 = vmatpush1.bf16.msra.mxu1 %v3325_v47  ;;  %v4403_v47 = vpack.c.bf16 %v348_v44, %v348_v44 }
 0x1f1   :  { %2539 = vmatpush1.bf16.msra.mxu0 %v3328_v48  ;;  %2499 = vmatprep.subr.bf16.mxu1 %v3333_v49  ;;  %v3408_v48 = vld [vmem:[%s4534_s5 + $0x2cc] ss:$16 sps:$4 sm:$0xff]   ;;  %v3406_v49 = vld [vmem:[%s4534_s5 + $0x2c8] ss:$16 sps:$4 sm:$0xff]  }
 0x1f2   :  { %2540 = vmatprep.subr.bf16.mxu0 %v3336_v50  ;;  %v3411_v50 = vld [vmem:[%s4534_s5 + $0x2ac] ss:$16 sps:$4 sm:$0xff]  }
 0x1f4   :  { %2500 = vmatpush1.bf16.msra.mxu1 %v3331_v51  ;;  %v3409_v51 = vld [vmem:[%s4534_s5 + $0x2a8] ss:$16 sps:$4 sm:$0xff]  }
 0x1f5   :  { %2541 = vmatpush1.bf16.msra.mxu0 %v3334_v52  ;;  %2501 = vmatprep.subr.bf16.mxu1 %v3339_v53  ;;  %v3417_v52 = vld [vmem:[%s4534_s5 + $0x26c] ss:$16 sps:$4 sm:$0xff]   ;;  %v3415_v53 = vld [vmem:[%s4534_s5 + $0x268] ss:$16 sps:$4 sm:$0xff]  }
 0x1f6   :  { %2542 = vmatprep.subr.bf16.mxu0 %v3342_v54  ;;  %v3420_v54 = vld [vmem:[%s4534_s5 + $0x24c] ss:$16 sps:$4 sm:$0xff]  }
 0x1f8   :  { %2502 = vmatpush1.bf16.msra.mxu1 %v3337_v55  ;;  %v3418_v55 = vld [vmem:[%s4534_s5 + $0x248] ss:$16 sps:$4 sm:$0xff]  }
 0x1f9   :  { %2543 = vmatpush1.bf16.msra.mxu0 %v3340_v56  ;;  %2503 = vmatprep.subr.bf16.mxu1 %v3345_v57  ;;  %v3423_v56 = vld [vmem:[%s4534_s5 + $0x22c] ss:$16 sps:$4 sm:$0xff]   ;;  %v3421_v57 = vld [vmem:[%s4534_s5 + $0x228] ss:$16 sps:$4 sm:$0xff]  }
 0x1fa   :  { %2544 = vmatprep.subr.bf16.mxu0 %v3348_v58  ;;  %v3426_v58 = vld [vmem:[%s4534_s5 + $0x20c] ss:$16 sps:$4 sm:$0xff]  }
 0x1fc   :  { %2504 = vmatpush1.bf16.msra.mxu1 %v3343_v59  ;;  %v3424_v59 = vld [vmem:[%s4534_s5 + $0x208] ss:$16 sps:$4 sm:$0xff]  }
 0x1fd   :  { %2545 = vmatpush1.bf16.msra.mxu0 %v3346_v60  ;;  %2505 = vmatprep.subr.bf16.mxu1 %v3351_v61  ;;  %v3429_v60 = vld [vmem:[%s4534_s5 + $0x3ec] ss:$16 sps:$4 sm:$0xff]   ;;  %v3427_v61 = vld [vmem:[%s4534_s5 + $0x3e8] ss:$16 sps:$4 sm:$0xff]  }
 0x1fe   :  { %2546 = vmatprep.subr.bf16.mxu0 %v3354_v0  ;;  %v3432_v0 = vld [vmem:[%s4534_s5 + $0x3cc] ss:$16 sps:$4 sm:$0xff]  }
 0x200   :  { %2506 = vmatpush1.bf16.msra.mxu1 %v3349_v1  ;;  %v3430_v1 = vld [vmem:[%s4534_s5 + $0x3c8] ss:$16 sps:$4 sm:$0xff]  }
 0x201   :  { %2547 = vmatpush1.bf16.msra.mxu0 %v3352_v2  ;;  %2507 = vmatprep.subr.bf16.mxu1 %v3357_v4  ;;  %v3435_v2 = vld [vmem:[%s4534_s5 + $0x3ac] ss:$16 sps:$4 sm:$0xff]   ;;  %v3433_v4 = vld [vmem:[%s4534_s5 + $0x3a8] ss:$16 sps:$4 sm:$0xff]  }
 0x202   :  { %2548 = vmatprep.subr.bf16.mxu0 %v3360_v5  ;;  %v3438_v5 = vld [vmem:[%s4534_s5 + $0x38c] ss:$16 sps:$4 sm:$0xff]  }
 0x204   :  { %2508 = vmatpush2.bf16.msra.mxu1 %v3355_v7  ;;  %v3436_v7 = vld [vmem:[%s4534_s5 + $0x388] ss:$16 sps:$4 sm:$0xff]  }
 0x205   :  { %2549 = vmatpush2.bf16.msra.mxu0 %v3358_v9  ;;  %2509 = vmatprep.subr.bf16.mxu1 %v3363_v11  ;;  %v3441_v9 = vld [vmem:[%s4534_s5 + $0x36c] ss:$16 sps:$4 sm:$0xff]   ;;  %v3439_v11 = vld [vmem:[%s4534_s5 + $0x368] ss:$16 sps:$4 sm:$0xff]  }
 0x206   :  { %2550 = vmatprep.subr.bf16.mxu0 %v3366_v13  ;;  %v3444_v13 = vld [vmem:[%s4534_s5 + $0x34c] ss:$16 sps:$4 sm:$0xff]  }
 0x208   :  { %2510 = vmatpush2.bf16.msra.mxu1 %v3361_v14  ;;  %v3442_v14 = vld [vmem:[%s4534_s5 + $0x348] ss:$16 sps:$4 sm:$0xff]  }
 0x209   :  { %2551 = vmatpush2.bf16.msra.mxu0 %v3364_v15  ;;  %2511 = vmatprep.subr.bf16.mxu1 %v3369_v40  ;;  %v3447_v15 = vld [vmem:[%s4534_s5 + $0x32c] ss:$16 sps:$4 sm:$0xff]   ;;  %v3445_v40 = vld [vmem:[%s4534_s5 + $0x328] ss:$16 sps:$4 sm:$0xff]  }
 0x20a   :  { %2552 = vmatprep.subr.bf16.mxu0 %v3372_v16  ;;  %v3450_v16 = vld [vmem:[%s4534_s5 + $0x30c] ss:$16 sps:$4 sm:$0xff]  }
 0x20c   :  { %2512 = vmatpush2.bf16.msra.mxu1 %v3367_v62  ;;  %v3448_v62 = vld [vmem:[%s4534_s5 + $0x308] ss:$16 sps:$4 sm:$0xff]  }
 0x20d   :  { %2553 = vmatpush2.bf16.msra.mxu0 %v3370_v17  ;;  %2513 = vmatprep.subr.bf16.mxu1 %v3375_v18 }
 0x20e   :  { %2554 = vmatprep.subr.bf16.mxu0 %v3378_v19 }
 0x210   :  { %2514 = vmatpush2.bf16.msra.mxu1 %v3373_v20 }
 0x211   :  { %2555 = vmatpush2.bf16.msra.mxu0 %v3376_v21  ;;  %2515 = vmatprep.subr.bf16.mxu1 %v3381_v6  ;;  %v2827_v6 = vld [vmem:[%s4533_s2 + $0x10] ss:$0 sm:$0xff] }
 0x212   :  { %2556 = vmatprep.subr.bf16.mxu0 %v3384_v22 }
 0x214   :  { %2516 = vmatpush2.bf16.msra.mxu1 %v3379_v23 }
 0x215   :  { %2557 = vmatpush2.bf16.msra.mxu0 %v3382_v12  ;;  %2517 = vmatprep.subr.bf16.mxu1 %v3387_v25 }
 0x216   :  { %2558 = vmatprep.subr.bf16.mxu0 %v3390_v26 }
 0x218   :  { %2518 = vmatpush2.bf16.msra.mxu1 %v3385_v38 }
 0x219   :  { %2559 = vmatpush2.bf16.msra.mxu0 %v3388_v3  ;;  %2519 = vmatprep.subr.bf16.mxu1 %v3393_v29 }
 0x21a   :  { %2560 = vmatprep.subr.bf16.mxu0 %v3396_v31 }
 0x21c   :  { %2520 = vmatpush2.bf16.msra.mxu1 %v3391_v32 }
 0x21d   :  { %2561 = vmatpush2.bf16.msra.mxu0 %v3394_v34  ;;  %2521 = vmatprep.subr.bf16.mxu1 %v3399_v35 }
 0x21e   :  { %2562 = vmatprep.subr.bf16.mxu0 %v3402_v36  ;;  %v29_v36 = vld [vmem:[%s4533_s2 + $0xc] sm:$0xf] }
 0x21f   :  { %v1797_v44 = vrot.slane %v29_v36, %v3761_v42 }
 0x220   :  { %2522 = vmatpush2.bf16.msra.mxu1 %v3397_v8  ;;  %v1793_v8 = vrot.slane %v29_v36, %v3750_v39 }
 0x221   :  { %2563 = vmatpush2.bf16.msra.mxu0 %v3400_v28  ;;  %2573 = vmatprep.subr.bf16.mxu1 %v3405_v45  ;;  %v31_v45 = vld [vmem:[%s4533_s2 + $0x11] sm:$0xf] }
 0x223   :  { %2524 = vmatmul.mubr.bf16.vlgmr.msra.gmra.mxu1 %v4403_v47 }
 0x224   :  { %2565 = vmatmul.mubr.bf16.vlgmr.msra.gmra.mxu0 %v4202_v63  ;;  %2574 = vmatpush1.bf16.msra.mxu1 %v3403_v46  ;;  %v3414_v63 = vld [vmem:[%s4534_s5 + $0x28c] ss:$16 sps:$4 sm:$0xff]  }
 0x225   :  { %2605 = vmatprep.mubr.bf16.mxu1 %v4207_v30  ;;  %2575 = vmatprep.subr.bf16.mxu1 %v3408_v48  ;;  %v3412_v30 = vld [vmem:[%s4534_s5 + $0x288] ss:$16 sps:$4 sm:$0xff]  }
 0x228   :  { %2576 = vmatpush1.bf16.msra.mxu1 %v3406_v49 }
 0x229   :  { %2577 = vmatprep.subr.bf16.mxu1 %v3411_v50 }
 0x22c   :  { %2578 = vmatpush1.bf16.msra.mxu1 %v3409_v51 }
 0x22d   :  { %2579 = vmatprep.subr.bf16.mxu1 %v3414_v63  ;;  %v2622_v63 = vrot.slane %v31_v45, %v3750_v39 }
 0x230   :  { %2580 = vmatpush1.bf16.msra.mxu1 %v3412_v30 }
 0x231   :  { %2581 = vmatprep.subr.bf16.mxu1 %v3417_v52  ;;  %v2626_v52 = vrot.slane %v31_v45, %v3761_v42 }
 0x234   :  { %2582 = vmatpush1.bf16.msra.mxu1 %v3415_v53 }
 0x235   :  { %2583 = vmatprep.subr.bf16.mxu1 %v3420_v54 }
 0x238   :  { %2584 = vmatpush1.bf16.msra.mxu1 %v3418_v55 }
 0x239   :  { %2585 = vmatprep.subr.bf16.mxu1 %v3423_v56 }
 0x23c   :  { %2586 = vmatpush1.bf16.msra.mxu1 %v3421_v57 }
 0x23d   :  { %2587 = vmatprep.subr.bf16.mxu1 %v3426_v58 }
 0x240   :  { %2588 = vmatpush1.bf16.msra.mxu1 %v3424_v59 }
 0x241   :  { %2589 = vmatprep.subr.bf16.mxu1 %v3429_v60 }
 0x244   :  { %2590 = vmatpush2.bf16.msra.mxu1 %v3427_v61 }
 0x245   :  { %2591 = vmatprep.subr.bf16.mxu1 %v3432_v0  ;;  %v1801_v0 = vrot.slane %v29_v36, %v3758_v41 }
 0x248   :  { %2592 = vmatpush2.bf16.msra.mxu1 %v3430_v1  ;;  %v1805_v1 = vrot.slane %v29_v36, %v3764_v43 }
 0x249   :  { %2593 = vmatprep.subr.bf16.mxu1 %v3435_v2 }
 0x24c   :  { %2594 = vmatpush2.bf16.msra.mxu1 %v3433_v4 }
 0x24d   :  { %2595 = vmatprep.subr.bf16.mxu1 %v3438_v5 }
 0x250   :  { %2596 = vmatpush2.bf16.msra.mxu1 %v3436_v7  ;;  %v2630_v7 = vrot.slane %v31_v45, %v3758_v41  ;;  %v2989_v41 = vld [vmem:[%s4533_s2 + $0x16] ss:$0 sm:$0xff] }
 0x251   :  { %2597 = vmatprep.subr.bf16.mxu1 %v3441_v9 }
 0x254   :  { %2598 = vmatpush2.bf16.msra.mxu1 %v3439_v11 }
 0x255   :  { %2599 = vmatprep.subr.bf16.mxu1 %v3444_v13  ;;  %v2634_v13 = vrot.slane %v31_v45, %v3764_v43 }
 0x258   :  { %2600 = vmatpush2.bf16.msra.mxu1 %v3442_v14 }
 0x259   :  { %2601 = vmatprep.subr.bf16.mxu1 %v3447_v15 }
 0x25c   :  { %2602 = vmatpush2.bf16.msra.mxu1 %v3445_v40 }
 0x25d   :  { %2603 = vmatprep.subr.bf16.mxu1 %v3450_v16 }
 0x260   :  { %2604 = vmatpush2.bf16.msra.mxu1 %v3448_v62 }
 0x263   :  { %2606 = vmatmul.mubr.bf16.vlgmr.msra.gmra.mxu1 %v4403_v47  ;;  %v3006_v17 = vpop.f32.mrf.mxu0 }
 0x265   :  { %v3007_v18 = vpop.f32.mrf.mxu0 }
 0x266   :  { %v3008_v21 = vadd.f32 %v3007_v18, %v3006_v17 }
 0x267   :  { %v3009_v19 = vpop.f32.mrf.mxu0 }
 0x268   :  { %v1612_v25 = vadd.f32 %v3008_v21, %v2827_v6  ;;  %v2660_v19 = vand.u32 127, %v54_v37 }
 0x269   :  { %v3010_v20 = vpop.f32.mrf.mxu0 }
 0x26a   :  { %vm2663_vm1 = vcmp.eq.s32.totalorder %v2660_v19, 5  ;;  %vm2661_vm2 = vcmp.eq.s32.totalorder %v2660_v19, 4 }
 0x2a3   :  { %v3028_v22 = vpop.f32.mrf.mxu1  ;;  %v2484_v23 = vpop.f32.mrf.mxu0 }
 0x2a4   :  { %v2485_v28 = vadd.f32 %v2484_v23, %v1793_v8 }
 0x2a5   :  { %v3029_v24 = vpop.f32.mrf.mxu1  ;;  %v2486_v12 = vpop.f32.mrf.mxu0 }
 0x2a6   :  { %v3030_v26 = vadd.f32 %v3029_v24, %v3028_v22  ;;  %v2487_v47 = vadd.f32 %v2486_v12, %v1797_v44 }
 0x2a7   :  { %v3031_v38 = vpop.f32.mrf.mxu1  ;;  %v2488_v27 = vpop.f32.mrf.mxu0 }
 0x2a8   :  { %v1652_v3 = vadd.f32 %v3030_v26, %v1612_v25 }
 0x2a9   :  { %v3032_v29 = vpop.f32.mrf.mxu1  ;;  %v2489_v31 = vpop.f32.mrf.mxu0 }
 0x2aa   :  { %v2648_v32 = vsub.f32 %v35_v10, %v1652_v3  ;;  %v2672_v43 = vadd.f32 %v2989_v41, %v1652_v3 }
 0x2ac   :  { %v2649_v34 = vmul.f32 %v2648_v32, %v2648_v32 }
 0x2ae   :  { %v2656_v35 = vmul.f32 %v2988_v33, %v2649_v34 }
 0x2b0   :  { %2657 = vadd.xlane.f32.xlu0 %v2656_v35 }
 0x2e3   :  { %v2525_v46 = vpop.f32.mrf.mxu1 }
 0x2e4   :  { %v2526_v48 = vadd.f32 %v2525_v46, %v2485_v28  ;;  %v2566_v49 = vpop.f32.mrf.mxu0 }
 0x2e5   :  { %v2527_v50 = vpop.f32.mrf.mxu1  ;;  %v2567_v2 = vadd.f32 %v2566_v49, %v1801_v0 }
 0x2e6   :  { %v2614_v51 = vmax.f32 %v2526_v48, 0.0  ;;  %v2528_v30 = vadd.f32 %v2527_v50, %v2487_v47  ;;  %v2568_v53 = vpop.f32.mrf.mxu0 }
 0x2e7   :  { %v2529_v54 = vpop.f32.mrf.mxu1  ;;  %v2569_v5 = vadd.f32 %v2568_v53, %v1805_v1 }
 0x2e8   :  { %v2615_v55 = vmax.f32 %v2528_v30, 0.0  ;;  %v2570_v56 = vpop.f32.mrf.mxu0  ;;  %v2639_v58 = vmul.f32 %v2622_v63, %v2614_v51 }
 0x2e9   :  { %v2530_v57 = vpop.f32.mrf.mxu1 }
 0x2ea   :  { %v2640_v59 = vmul.f32 %v2626_v52, %v2615_v55  ;;  %v2571_v60 = vpop.f32.mrf.mxu0 }
 0x2ec   :  { %v2643_v61 = vadd.f32 %v2640_v59, %v2639_v58 }
 0x323   :  { %v2607_v4 = vpop.f32.mrf.mxu1 }
 0x324   :  { %v2608_v39 = vadd.f32 %v2607_v4, %v2567_v2 }
 0x325   :  { %v2609_v42 = vpop.f32.mrf.mxu1 }
 0x326   :  { %v2616_v9 = vmax.f32 %v2608_v39, 0.0  ;;  %v2610_v11 = vadd.f32 %v2609_v42, %v2569_v5 }
 0x327   :  { %v2611_v14 = vpop.f32.mrf.mxu1 }
 0x328   :  { %v2641_v15 = vmul.f32 %v2630_v7, %v2616_v9  ;;  %v2617_v40 = vmax.f32 %v2610_v11, 0.0 }
 0x329   :  { %v2612_v16 = vpop.f32.mrf.mxu1 }
 0x32a   :  { %v2642_v62 = vmul.f32 %v2634_v13, %v2617_v40  ;;  %v2644_v17 = vadd.f32 %v2643_v61, %v2641_v15 }
 0x32c   :  { %v2645_v18 = vadd.f32 %v2644_v17, %v2642_v62 }
 0x32e   :  { %2646 = vadd.xlane.f32.xlu0 %v2645_v18 }
 0x339   :  { %v2658_v20 = vpop.xlane.xlu0 %2657 }
 0x33a   :  { %v2662_v21 = vmul.f32 -0.5, %v2658_v20 }
 0x3b7   :  { %v2647_v6 = vpop.xlane.xlu0 %2646 }
 0x3b8   :  { %v2664_v22 = vsel %vm2663_vm1, %v2647_v6, 0.0 }
 0x3b9   :  { %v2665_v23 = vsel %vm2661_vm2, %v2662_v21, %v2664_v22 }
 0x3ba   :  { %v2673_v24 = vadd.f32 %v2672_v43, %v2665_v23 }
 0x3bc   :  { %2674 = vst [vmem:[%s4536_s7] sm:$0xff] %v2673_v24 }

</bundles_post_ra>
